<compile_context>
chip_gen: v7x
topology: tpu7x:2x2x1
jax: 0.10.0
libtpu: 0.0.40
codegen_flags: <defaults>
</compile_context>

<pallas_src>
import functools

import jax
import jax.numpy as jnp
from jax import lax
from jax.experimental import pallas as pl
from jax.experimental.pallas import tpu as pltpu

BP = 8  # sublane-tile padded batch rows per timestep (f32 tile is (8, 128))


def _round_up(n, m):
    return ((n + m - 1) // m) * m


# ---------------------------------------------------------------------------
# Packed-weight layout
# ---------------------------------------------------------------------------
# Fused gate-column layout (each block is H lanes wide, total 8H lanes):
#   [ i0 | i1 | f0 | f1 | o0 | o1 | g0 | g1 ]
# sigmoid gates are lanes [0, 6H); tanh gate (g) lanes [6H, 8H).
def _gate_cols(gate, layer, H):
    block = {'i': 0, 'f': 2, 'o': 4, 'g': 6}[gate] + layer
    return block * H, (block + 1) * H


def _place_gates(dst, row0, mat_t, layer, H):
    """Scatter a (..., 4H) tensor in PyTorch [i,f,g,o] order into fused cols."""
    order = ('i', 'f', 'g', 'o')
    for gi, gate in enumerate(order):
        c0, c1 = _gate_cols(gate, layer, H)
        src = mat_t[..., gi * H:(gi + 1) * H]
        if mat_t.ndim == 1:
            dst = dst.at[row0, c0:c1].set(src)
        else:
            dst = dst.at[row0:row0 + mat_t.shape[0], c0:c1].set(src)
    return dst


def _weight_layout(input_dim, hidden_dim):
    """Row offsets of every block inside the packed (R, 8H) weight matrix."""
    H = hidden_dim
    offs, row = {}, 0
    offs['wih0'] = row; row += _round_up(input_dim, 8)   # layer-0 input proj
    offs['bias'] = row; row += 8                         # fused bias row (b0|b1)
    offs['rec'] = row; row += _round_up(2 * H, 8)        # fused recurrent RHS
    offs['wfc'] = row; row += _round_up(H, 8)            # FC weight (lanes 0:128)
    offs['bfc'] = row; row += 8                          # FC bias   (lanes 0:128)
    return offs, row


def _pack_weights(params, input_dim, hidden_dim, output_dim):
    H, O, D = hidden_dim, output_dim, input_dim
    WPK = 8 * H
    assert O <= 128 <= WPK
    offs, rows = _weight_layout(D, H)
    wp = jnp.zeros((rows, WPK), jnp.float32)

    wih0, whh0, bih0, bhh0 = params['lstm_0']
    wih1, whh1, bih1, bhh1 = params['lstm_1']
    wfc, bfc = params['fc']

    # Hoisted layer-0 input projection columns.
    wp = _place_gates(wp, offs['wih0'], wih0.T, 0, H)
    # Fused bias row: b0 in layer-0 gate cols, b1 in layer-1 gate cols.
    wp = _place_gates(wp, offs['bias'], bih0 + bhh0, 0, H)
    wp = _place_gates(wp, offs['bias'], bih1 + bhh1, 1, H)
    # Fused recurrent RHS: rows 0:H multiply h0, rows H:2H multiply h1.
    #   [[ whh0^T | wih1^T ],
    #    [   0    | whh1^T ]]
    wp = _place_gates(wp, offs['rec'], whh0.T, 0, H)
    wp = _place_gates(wp, offs['rec'], wih1.T, 1, H)
    wp = _place_gates(wp, offs['rec'] + H, whh1.T, 1, H)
    # FC epilogue: lanes [0, O) of the first 128 packed lanes; rest stay zero.
    wp = wp.at[offs['wfc']:offs['wfc'] + H, :O].set(wfc.T)
    wp = wp.at[offs['bfc'], :O].set(bfc)
    return wp


# ---------------------------------------------------------------------------
# Kernel
# ---------------------------------------------------------------------------
def _make_kernel(T, D, H, offs):
    H2 = 2 * H
    WO = 128  # lane-dense per-timestep FC output block

    def kernel(x_ref, w_ref, out_ref, xpb_ref):
        # x_ref  : (T*BP, D)    time-major input, 8 padded rows per timestep
        # w_ref  : (R, 8H)      packed weights (see _weight_layout)
        # out_ref: (BP, T*128)  batch-major FC output; lanes [t*128, t*128+O)
        # xpb_ref: (T*BP, 8H)   hoisted layer-0 projection + fused bias
        wih0 = w_ref[offs['wih0']:offs['wih0'] + D, :]
        bias = w_ref[offs['bias']:offs['bias'] + 1, :]
        rec = w_ref[offs['rec']:offs['rec'] + H2, :]
        wfc = w_ref[offs['wfc']:offs['wfc'] + H, :WO]
        bfc = w_ref[offs['bfc']:offs['bfc'] + 1, :WO]

        # Hoisted input projection: one (T*BP, D) @ (D, 8H) matmul + bias.
        # Padded rows (zeros) just pick up the bias; they are never read back.
        xpb_ref[...] = jnp.dot(x_ref[...], wih0,
                               preferred_element_type=jnp.float32) + bias

        def gates(z):
            zs = jax.nn.sigmoid(z[:, :6 * H])   # [i0,i1,f0,f1,o0,o1]
            zt = jnp.tanh(z[:, 6 * H:])         # [g0,g1]
            return zs[:, 0:H2], zs[:, H2:2 * H2], zs[:, 2 * H2:3 * H2], zt

        lane = lax.broadcasted_iota(jnp.int32, (BP, H2), 1)
        l0_mask = lane < H  # layer-0 lanes of the packed (BP, 2H) state

        # Wavefront step s = 0: only layer 0 runs (all states are zero,
        # so the recurrent matmul is skipped).  Layer-1 halves stay zero.
        i_a, f_a, o_a, g_a = gates(xpb_ref[0:BP, :])
        c_all = jnp.where(l0_mask, i_a * g_a, 0.0)
        h_all = jnp.where(l0_mask, o_a * jnp.tanh(c_all), 0.0)

        # Wavefront steps s = 1..T:
        #   layer 0 advances to timestep s (valid while s < T; at s == T its
        #   half computes harmless garbage that is never read),
        #   layer 1 advances to timestep s-1 and its output goes through FC.
        for s in range(1, T + 1):
            tx = min(s, T - 1)  # xpb row block (layer-1 cols are the constant b1)
            z = xpb_ref[tx * BP:(tx + 1) * BP, :] + jnp.dot(
                h_all, rec, preferred_element_type=jnp.float32)   # (BP, 8H)
            i_a, f_a, o_a, g_a = gates(z)
            c_all = f_a * c_all + i_a * g_a
            h_all = o_a * jnp.tanh(c_all)
            # FC for layer-1 output at timestep s-1, stored batch-major as an
            # aligned (BP, 128) tile.  Off the recurrent critical path.
            h1 = h_all[:, H:H2]
            out_ref[:, (s - 1) * WO:s * WO] = jnp.dot(
                h1, wfc, preferred_element_type=jnp.float32) + bfc

    return kernel


# ---------------------------------------------------------------------------
# Wrapper
# ---------------------------------------------------------------------------
def mynet_forward(x, params, *, num_layers, hidden_dim, output_dim):
    """Equivalent of MyNet.forward (h0/c0 zeros). Wavefront-fused 2-layer LSTM."""
    assert num_layers == 2, "wavefront-fused kernel is specialized to 2 layers"
    B, T, D = x.shape
    H, O = hidden_dim, output_dim
    assert B <= BP

    offs, _ = _weight_layout(D, H)
    wpack = _pack_weights(params, D, H, O)

    # Time-major, sublane-tile (8-row) padded batch per timestep.
    xt = jnp.transpose(x, (1, 0, 2)).astype(jnp.float32)   # (T, B, D)
    xt = jnp.pad(xt, ((0, 0), (0, BP - B), (0, 0)))        # (T, BP, D)
    x2d = xt.reshape(T * BP, D)

    kernel = _make_kernel(T, D, H, offs)
    out = pl.pallas_call(
        kernel,
        out_shape=jax.ShapeDtypeStruct((BP, T * 128), jnp.float32),
        in_specs=[pl.BlockSpec(memory_space=pltpu.MemorySpace.VMEM),
                  pl.BlockSpec(memory_space=pltpu.MemorySpace.VMEM)],
        out_specs=pl.BlockSpec(memory_space=pltpu.MemorySpace.VMEM),
        scratch_shapes=[pltpu.VMEM((T * BP, 8 * H), jnp.float32)],
    )(x2d, wpack)

    # Batch-major output: one reshape + one slice (no transpose).
    out = out.reshape(BP, T, 128)[:B, :, :O]               # (B, T, O)
    return out.reshape(B, 15, 5)                           # out.view(B, 15, 5)


# ---------------------------------------------------------------------------
# Params / reference
# ---------------------------------------------------------------------------
def init_params(key, input_dim, hidden_dim, output_dim, num_layers):
    """PyTorch-shaped params, uniform(-1/sqrt(H), 1/sqrt(H))."""
    H = hidden_dim
    params = {}
    k = 1.0 / float(jnp.sqrt(jnp.float32(H)))
    keys = jax.random.split(key, 4 * num_layers + 2)
    idx = 0
    for l in range(num_layers):
        din = input_dim if l == 0 else H
        wih = jax.random.uniform(keys[idx], (4 * H, din), jnp.float32, -k, k); idx += 1
        whh = jax.random.uniform(keys[idx], (4 * H, H), jnp.float32, -k, k); idx += 1
        bih = jax.random.uniform(keys[idx], (4 * H,), jnp.float32, -k, k); idx += 1
        bhh = jax.random.uniform(keys[idx], (4 * H,), jnp.float32, -k, k); idx += 1
        params[f'lstm_{l}'] = (wih, whh, bih, bhh)
    wfc = jax.random.uniform(keys[idx], (output_dim, H), jnp.float32, -k, k); idx += 1
    bfc = jax.random.uniform(keys[idx], (output_dim,), jnp.float32, -k, k)
    params['fc'] = (wfc, bfc)
    return params


def mynet_reference(x, params, *, num_layers, hidden_dim, output_dim):
    """Pure-JAX reference of MyNet.forward for correctness checking."""
    B, T, _ = x.shape
    H = hidden_dim
    inp = x
    for l in range(num_layers):
        wih, whh, bih, bhh = params[f'lstm_{l}']
        h = jnp.zeros((B, H), jnp.float32)
        c = jnp.zeros((B, H), jnp.float32)
        outs = []
        for t in range(T):
            z = inp[:, t, :] @ wih.T + h @ whh.T + bih + bhh
            i_g = jax.nn.sigmoid(z[:, :H])
            f_g = jax.nn.sigmoid(z[:, H:2 * H])
            g_g = jnp.tanh(z[:, 2 * H:3 * H])
            o_g = jax.nn.sigmoid(z[:, 3 * H:])
            c = f_g * c + i_g * g_g
            h = o_g * jnp.tanh(c)
            outs.append(h)
        inp = jnp.stack(outs, axis=1)
    wfc, bfc = params['fc']
    out = inp @ wfc.T + bfc
    return out.reshape(B, 15, 5)


if __name__ == "__main__":
    # forward() requires seq_len * output_dim == 15 * 5 -> seq_len=15, output_dim=5.
    input_dim, hidden_dim, output_dim, num_layers = 8, 32, 5, 2
    batch, seq_len = 2, 15

    key = jax.random.PRNGKey(0)
    kx, kp = jax.random.split(key)
    x = jax.random.normal(kx, (batch, seq_len, input_dim), jnp.float32)
    params = init_params(kp, input_dim, hidden_dim, output_dim, num_layers)

    fwd = jax.jit(functools.partial(mynet_forward, num_layers=num_layers,
                                    hidden_dim=hidden_dim, output_dim=output_dim))
    out = fwd(x, params)
    jax.block_until_ready(out)

    ref = mynet_reference(x, params, num_layers=num_layers,
                          hidden_dim=hidden_dim, output_dim=output_dim)
    assert out.shape == (batch, 15, 5), out.shape
    assert jnp.allclose(out, ref, rtol=1e-4, atol=1e-4), "mismatch vs reference"

    print("KERNEL_OK")
</pallas_src>

<mosaic_0001>
module attributes {stable_mosaic.version = 11 : i64} {
  func.func @kernel(%arg0: memref<120x8xf32, #tpu.memory_space<vmem>>, %arg1: memref<120x256xf32, #tpu.memory_space<vmem>>, %arg2: memref<8x1920xf32, #tpu.memory_space<vmem>>, %arg3: memref<120x256xf32, #tpu.memory_space<vmem>>) attributes {dimension_semantics = [], scalar_prefetch = 0 : i64, scratch_operands = 1 : i64, tpu.core_type = #tpu.core_type<tc>} {
    %c0 = arith.constant 0 : index
    %c0_0 = arith.constant 0 : index
    %0 = vector.load %arg1[%c0, %c0_0] : memref<120x256xf32, #tpu.memory_space<vmem>>, vector<8x256xf32>
    %c8 = arith.constant 8 : index
    %c0_1 = arith.constant 0 : index
    %1 = vector.load %arg1[%c8, %c0_1] : memref<120x256xf32, #tpu.memory_space<vmem>>, vector<1x256xf32>
    %c16 = arith.constant 16 : index
    %c0_2 = arith.constant 0 : index
    %2 = vector.load %arg1[%c16, %c0_2] : memref<120x256xf32, #tpu.memory_space<vmem>>, vector<64x256xf32>
    %c80 = arith.constant 80 : index
    %c0_3 = arith.constant 0 : index
    %3 = vector.load %arg1[%c80, %c0_3] : memref<120x256xf32, #tpu.memory_space<vmem>>, vector<32x128xf32>
    %c112 = arith.constant 112 : index
    %c0_4 = arith.constant 0 : index
    %4 = vector.load %arg1[%c112, %c0_4] : memref<120x256xf32, #tpu.memory_space<vmem>>, vector<1x128xf32>
    %c0_5 = arith.constant 0 : index
    %c0_6 = arith.constant 0 : index
    %5 = vector.load %arg0[%c0_5, %c0_6] : memref<120x8xf32, #tpu.memory_space<vmem>>, vector<120x8xf32>
    %cst = arith.constant dense<0.000000e+00> : vector<120x256xf32>
    %6 = tpu.matmul %5, %0, %cst {dimension_numbers = #tpu.dot_dimension_numbers<[1], [0], [0], [1], [0, 0, 1, 1], [], []>} : vector<120x8xf32>, vector<8x256xf32>, vector<120x256xf32> -> vector<120x256xf32>
    %7 = vector.broadcast %1 : vector<1x256xf32> to vector<120x256xf32>
    %8 = arith.addf %6, %7 : vector<120x256xf32>
    %c0_7 = arith.constant 0 : index
    %c0_8 = arith.constant 0 : index
    %9 = vector.load %arg3[%c0_7, %c0_8] : memref<120x256xf32, #tpu.memory_space<vmem>>, vector<120x256xf32>
    tpu.vector_store %arg3[%c0_7, %c0_8], %8 {strides = array<i32>} : memref<120x256xf32, #tpu.memory_space<vmem>>, vector<120x256xf32>,
    %10 = tpu.iota {dimensions = array<i32: 1>} : vector<8x64xi32>
    %c32_i32 = arith.constant 32 : i32
    %11 = vector.broadcast %c32_i32 : i32 to vector<8x64xi32>
    %12 = arith.cmpi slt, %10, %11 : vector<8x64xi32>
    %c0_9 = arith.constant 0 : index
    %c0_10 = arith.constant 0 : index
    %13 = vector.load %arg3[%c0_9, %c0_10] : memref<120x256xf32, #tpu.memory_space<vmem>>, vector<8x256xf32>
    %14 = vector.extract_strided_slice %13 {offsets = [0, 0], sizes = [8, 192], strides = [1, 1]} : vector<8x256xf32> to vector<8x192xf32>
    %15 = arith.negf %14 : vector<8x192xf32>
    %16 = math.exp %15 : vector<8x192xf32>
    %cst_11 = arith.constant 1.000000e+00 : f32
    %17 = vector.broadcast %cst_11 : f32 to vector<8x192xf32>
    %18 = arith.addf %17, %16 : vector<8x192xf32>
    %19 = arith.divf %17, %18 : vector<8x192xf32>
    %20 = vector.extract_strided_slice %13 {offsets = [0, 192], sizes = [8, 64], strides = [1, 1]} : vector<8x256xf32> to vector<8x64xf32>
    %21 = math.tanh %20 : vector<8x64xf32>
    %22 = vector.extract_strided_slice %19 {offsets = [0, 0], sizes = [8, 64], strides = [1, 1]} : vector<8x192xf32> to vector<8x64xf32>
    %23 = vector.extract_strided_slice %19 {offsets = [0, 128], sizes = [8, 64], strides = [1, 1]} : vector<8x192xf32> to vector<8x64xf32>
    %24 = arith.mulf %22, %21 : vector<8x64xf32>
    %cst_12 = arith.constant 0.000000e+00 : f32
    %25 = vector.broadcast %cst_12 : f32 to vector<8x64xf32>
    %26 = arith.select %12, %24, %25 : vector<8x64xi1>, vector<8x64xf32>
    %27 = math.tanh %26 : vector<8x64xf32>
    %28 = arith.mulf %23, %27 : vector<8x64xf32>
    %cst_13 = arith.constant 0.000000e+00 : f32
    %29 = vector.broadcast %cst_13 : f32 to vector<8x64xf32>
    %30 = arith.select %12, %28, %29 : vector<8x64xi1>, vector<8x64xf32>
    %c8_14 = arith.constant 8 : index
    %c0_15 = arith.constant 0 : index
    %31 = vector.load %arg3[%c8_14, %c0_15] : memref<120x256xf32, #tpu.memory_space<vmem>>, vector<8x256xf32>
    %cst_16 = arith.constant dense<0.000000e+00> : vector<8x256xf32>
    %32 = tpu.matmul %30, %2, %cst_16 {dimension_numbers = #tpu.dot_dimension_numbers<[1], [0], [0], [1], [0, 0, 1, 1], [], []>} : vector<8x64xf32>, vector<64x256xf32>, vector<8x256xf32> -> vector<8x256xf32>
    %33 = arith.addf %31, %32 : vector<8x256xf32>
    %34 = vector.extract_strided_slice %33 {offsets = [0, 0], sizes = [8, 192], strides = [1, 1]} : vector<8x256xf32> to vector<8x192xf32>
    %35 = arith.negf %34 : vector<8x192xf32>
    %36 = math.exp %35 : vector<8x192xf32>
    %cst_17 = arith.constant 1.000000e+00 : f32
    %37 = vector.broadcast %cst_17 : f32 to vector<8x192xf32>
    %38 = arith.addf %37, %36 : vector<8x192xf32>
    %39 = arith.divf %37, %38 : vector<8x192xf32>
    %40 = vector.extract_strided_slice %33 {offsets = [0, 192], sizes = [8, 64], strides = [1, 1]} : vector<8x256xf32> to vector<8x64xf32>
    %41 = math.tanh %40 : vector<8x64xf32>
    %42 = vector.extract_strided_slice %39 {offsets = [0, 0], sizes = [8, 64], strides = [1, 1]} : vector<8x192xf32> to vector<8x64xf32>
    %43 = vector.extract_strided_slice %39 {offsets = [0, 64], sizes = [8, 64], strides = [1, 1]} : vector<8x192xf32> to vector<8x64xf32>
    %44 = vector.extract_strided_slice %39 {offsets = [0, 128], sizes = [8, 64], strides = [1, 1]} : vector<8x192xf32> to vector<8x64xf32>
    %45 = arith.mulf %43, %26 : vector<8x64xf32>
    %46 = arith.mulf %42, %41 : vector<8x64xf32>
    %47 = arith.addf %45, %46 : vector<8x64xf32>
    %48 = math.tanh %47 : vector<8x64xf32>
    %49 = arith.mulf %44, %48 : vector<8x64xf32>
    %50 = vector.extract_strided_slice %49 {offsets = [0, 32], sizes = [8, 32], strides = [1, 1]} : vector<8x64xf32> to vector<8x32xf32>
    %cst_18 = arith.constant dense<0.000000e+00> : vector<8x128xf32>
    %51 = tpu.matmul %50, %3, %cst_18 {dimension_numbers = #tpu.dot_dimension_numbers<[1], [0], [0], [1], [0, 0, 1, 1], [], []>} : vector<8x32xf32>, vector<32x128xf32>, vector<8x128xf32> -> vector<8x128xf32>
    %52 = vector.broadcast %4 : vector<1x128xf32> to vector<8x128xf32>
    %53 = arith.addf %51, %52 : vector<8x128xf32>
    %c0_19 = arith.constant 0 : index
    %c0_20 = arith.constant 0 : index
    %54 = vector.load %arg2[%c0_19, %c0_20] : memref<8x1920xf32, #tpu.memory_space<vmem>>, vector<8x128xf32>
    tpu.vector_store %arg2[%c0_19, %c0_20], %53 {strides = array<i32>} : memref<8x1920xf32, #tpu.memory_space<vmem>>, vector<8x128xf32>,
    %c16_21 = arith.constant 16 : index
    %c0_22 = arith.constant 0 : index
    %55 = vector.load %arg3[%c16_21, %c0_22] : memref<120x256xf32, #tpu.memory_space<vmem>>, vector<8x256xf32>
    %cst_23 = arith.constant dense<0.000000e+00> : vector<8x256xf32>
    %56 = tpu.matmul %49, %2, %cst_23 {dimension_numbers = #tpu.dot_dimension_numbers<[1], [0], [0], [1], [0, 0, 1, 1], [], []>} : vector<8x64xf32>, vector<64x256xf32>, vector<8x256xf32> -> vector<8x256xf32>
    %57 = arith.addf %55, %56 : vector<8x256xf32>
    %58 = vector.extract_strided_slice %57 {offsets = [0, 0], sizes = [8, 192], strides = [1, 1]} : vector<8x256xf32> to vector<8x192xf32>
    %59 = arith.negf %58 : vector<8x192xf32>
    %60 = math.exp %59 : vector<8x192xf32>
    %cst_24 = arith.constant 1.000000e+00 : f32
    %61 = vector.broadcast %cst_24 : f32 to vector<8x192xf32>
    %62 = arith.addf %61, %60 : vector<8x192xf32>
    %63 = arith.divf %61, %62 : vector<8x192xf32>
    %64 = vector.extract_strided_slice %57 {offsets = [0, 192], sizes = [8, 64], strides = [1, 1]} : vector<8x256xf32> to vector<8x64xf32>
    %65 = math.tanh %64 : vector<8x64xf32>
    %66 = vector.extract_strided_slice %63 {offsets = [0, 0], sizes = [8, 64], strides = [1, 1]} : vector<8x192xf32> to vector<8x64xf32>
    %67 = vector.extract_strided_slice %63 {offsets = [0, 64], sizes = [8, 64], strides = [1, 1]} : vector<8x192xf32> to vector<8x64xf32>
    %68 = vector.extract_strided_slice %63 {offsets = [0, 128], sizes = [8, 64], strides = [1, 1]} : vector<8x192xf32> to vector<8x64xf32>
    %69 = arith.mulf %67, %47 : vector<8x64xf32>
    %70 = arith.mulf %66, %65 : vector<8x64xf32>
    %71 = arith.addf %69, %70 : vector<8x64xf32>
    %72 = math.tanh %71 : vector<8x64xf32>
    %73 = arith.mulf %68, %72 : vector<8x64xf32>
    %74 = vector.extract_strided_slice %73 {offsets = [0, 32], sizes = [8, 32], strides = [1, 1]} : vector<8x64xf32> to vector<8x32xf32>
    %cst_25 = arith.constant dense<0.000000e+00> : vector<8x128xf32>
    %75 = tpu.matmul %74, %3, %cst_25 {dimension_numbers = #tpu.dot_dimension_numbers<[1], [0], [0], [1], [0, 0, 1, 1], [], []>} : vector<8x32xf32>, vector<32x128xf32>, vector<8x128xf32> -> vector<8x128xf32>
    %76 = vector.broadcast %4 : vector<1x128xf32> to vector<8x128xf32>
    %77 = arith.addf %75, %76 : vector<8x128xf32>
    %c0_26 = arith.constant 0 : index
    %c128 = arith.constant 128 : index
    %78 = vector.load %arg2[%c0_26, %c128] : memref<8x1920xf32, #tpu.memory_space<vmem>>, vector<8x128xf32>
    tpu.vector_store %arg2[%c0_26, %c128], %77 {strides = array<i32>} : memref<8x1920xf32, #tpu.memory_space<vmem>>, vector<8x128xf32>,
    %c24 = arith.constant 24 : index
    %c0_27 = arith.constant 0 : index
    %79 = vector.load %arg3[%c24, %c0_27] : memref<120x256xf32, #tpu.memory_space<vmem>>, vector<8x256xf32>
    %cst_28 = arith.constant dense<0.000000e+00> : vector<8x256xf32>
    %80 = tpu.matmul %73, %2, %cst_28 {dimension_numbers = #tpu.dot_dimension_numbers<[1], [0], [0], [1], [0, 0, 1, 1], [], []>} : vector<8x64xf32>, vector<64x256xf32>, vector<8x256xf32> -> vector<8x256xf32>
    %81 = arith.addf %79, %80 : vector<8x256xf32>
    %82 = vector.extract_strided_slice %81 {offsets = [0, 0], sizes = [8, 192], strides = [1, 1]} : vector<8x256xf32> to vector<8x192xf32>
    %83 = arith.negf %82 : vector<8x192xf32>
    %84 = math.exp %83 : vector<8x192xf32>
    %cst_29 = arith.constant 1.000000e+00 : f32
    %85 = vector.broadcast %cst_29 : f32 to vector<8x192xf32>
    %86 = arith.addf %85, %84 : vector<8x192xf32>
    %87 = arith.divf %85, %86 : vector<8x192xf32>
    %88 = vector.extract_strided_slice %81 {offsets = [0, 192], sizes = [8, 64], strides = [1, 1]} : vector<8x256xf32> to vector<8x64xf32>
    %89 = math.tanh %88 : vector<8x64xf32>
    %90 = vector.extract_strided_slice %87 {offsets = [0, 0], sizes = [8, 64], strides = [1, 1]} : vector<8x192xf32> to vector<8x64xf32>
    %91 = vector.extract_strided_slice %87 {offsets = [0, 64], sizes = [8, 64], strides = [1, 1]} : vector<8x192xf32> to vector<8x64xf32>
    %92 = vector.extract_strided_slice %87 {offsets = [0, 128], sizes = [8, 64], strides = [1, 1]} : vector<8x192xf32> to vector<8x64xf32>
    %93 = arith.mulf %91, %71 : vector<8x64xf32>
    %94 = arith.mulf %90, %89 : vector<8x64xf32>
    %95 = arith.addf %93, %94 : vector<8x64xf32>
    %96 = math.tanh %95 : vector<8x64xf32>
    %97 = arith.mulf %92, %96 : vector<8x64xf32>
    %98 = vector.extract_strided_slice %97 {offsets = [0, 32], sizes = [8, 32], strides = [1, 1]} : vector<8x64xf32> to vector<8x32xf32>
    %cst_30 = arith.constant dense<0.000000e+00> : vector<8x128xf32>
    %99 = tpu.matmul %98, %3, %cst_30 {dimension_numbers = #tpu.dot_dimension_numbers<[1], [0], [0], [1], [0, 0, 1, 1], [], []>} : vector<8x32xf32>, vector<32x128xf32>, vector<8x128xf32> -> vector<8x128xf32>
    %100 = vector.broadcast %4 : vector<1x128xf32> to vector<8x128xf32>
    %101 = arith.addf %99, %100 : vector<8x128xf32>
    %c0_31 = arith.constant 0 : index
    %c256 = arith.constant 256 : index
    %102 = vector.load %arg2[%c0_31, %c256] : memref<8x1920xf32, #tpu.memory_space<vmem>>, vector<8x128xf32>
    tpu.vector_store %arg2[%c0_31, %c256], %101 {strides = array<i32>} : memref<8x1920xf32, #tpu.memory_space<vmem>>, vector<8x128xf32>,
    %c32 = arith.constant 32 : index
    %c0_32 = arith.constant 0 : index
    %103 = vector.load %arg3[%c32, %c0_32] : memref<120x256xf32, #tpu.memory_space<vmem>>, vector<8x256xf32>
    %cst_33 = arith.constant dense<0.000000e+00> : vector<8x256xf32>
    %104 = tpu.matmul %97, %2, %cst_33 {dimension_numbers = #tpu.dot_dimension_numbers<[1], [0], [0], [1], [0, 0, 1, 1], [], []>} : vector<8x64xf32>, vector<64x256xf32>, vector<8x256xf32> -> vector<8x256xf32>
    %105 = arith.addf %103, %104 : vector<8x256xf32>
    %106 = vector.extract_strided_slice %105 {offsets = [0, 0], sizes = [8, 192], strides = [1, 1]} : vector<8x256xf32> to vector<8x192xf32>
    %107 = arith.negf %106 : vector<8x192xf32>
    %108 = math.exp %107 : vector<8x192xf32>
    %cst_34 = arith.constant 1.000000e+00 : f32
    %109 = vector.broadcast %cst_34 : f32 to vector<8x192xf32>
    %110 = arith.addf %109, %108 : vector<8x192xf32>
    %111 = arith.divf %109, %110 : vector<8x192xf32>
    %112 = vector.extract_strided_slice %105 {offsets = [0, 192], sizes = [8, 64], strides = [1, 1]} : vector<8x256xf32> to vector<8x64xf32>
    %113 = math.tanh %112 : vector<8x64xf32>
    %114 = vector.extract_strided_slice %111 {offsets = [0, 0], sizes = [8, 64], strides = [1, 1]} : vector<8x192xf32> to vector<8x64xf32>
    %115 = vector.extract_strided_slice %111 {offsets = [0, 64], sizes = [8, 64], strides = [1, 1]} : vector<8x192xf32> to vector<8x64xf32>
    %116 = vector.extract_strided_slice %111 {offsets = [0, 128], sizes = [8, 64], strides = [1, 1]} : vector<8x192xf32> to vector<8x64xf32>
    %117 = arith.mulf %115, %95 : vector<8x64xf32>
    %118 = arith.mulf %114, %113 : vector<8x64xf32>
    %119 = arith.addf %117, %118 : vector<8x64xf32>
    %120 = math.tanh %119 : vector<8x64xf32>
    %121 = arith.mulf %116, %120 : vector<8x64xf32>
    %122 = vector.extract_strided_slice %121 {offsets = [0, 32], sizes = [8, 32], strides = [1, 1]} : vector<8x64xf32> to vector<8x32xf32>
    %cst_35 = arith.constant dense<0.000000e+00> : vector<8x128xf32>
    %123 = tpu.matmul %122, %3, %cst_35 {dimension_numbers = #tpu.dot_dimension_numbers<[1], [0], [0], [1], [0, 0, 1, 1], [], []>} : vector<8x32xf32>, vector<32x128xf32>, vector<8x128xf32> -> vector<8x128xf32>
    %124 = vector.broadcast %4 : vector<1x128xf32> to vector<8x128xf32>
    %125 = arith.addf %123, %124 : vector<8x128xf32>
    %c0_36 = arith.constant 0 : index
    %c384 = arith.constant 384 : index
    %126 = vector.load %arg2[%c0_36, %c384] : memref<8x1920xf32, #tpu.memory_space<vmem>>, vector<8x128xf32>
    tpu.vector_store %arg2[%c0_36, %c384], %125 {strides = array<i32>} : memref<8x1920xf32, #tpu.memory_space<vmem>>, vector<8x128xf32>,
    %c40 = arith.constant 40 : index
    %c0_37 = arith.constant 0 : index
    %127 = vector.load %arg3[%c40, %c0_37] : memref<120x256xf32, #tpu.memory_space<vmem>>, vector<8x256xf32>
    %cst_38 = arith.constant dense<0.000000e+00> : vector<8x256xf32>
    %128 = tpu.matmul %121, %2, %cst_38 {dimension_numbers = #tpu.dot_dimension_numbers<[1], [0], [0], [1], [0, 0, 1, 1], [], []>} : vector<8x64xf32>, vector<64x256xf32>, vector<8x256xf32> -> vector<8x256xf32>
    %129 = arith.addf %127, %128 : vector<8x256xf32>
    %130 = vector.extract_strided_slice %129 {offsets = [0, 0], sizes = [8, 192], strides = [1, 1]} : vector<8x256xf32> to vector<8x192xf32>
    %131 = arith.negf %130 : vector<8x192xf32>
    %132 = math.exp %131 : vector<8x192xf32>
    %cst_39 = arith.constant 1.000000e+00 : f32
    %133 = vector.broadcast %cst_39 : f32 to vector<8x192xf32>
    %134 = arith.addf %133, %132 : vector<8x192xf32>
    %135 = arith.divf %133, %134 : vector<8x192xf32>
    %136 = vector.extract_strided_slice %129 {offsets = [0, 192], sizes = [8, 64], strides = [1, 1]} : vector<8x256xf32> to vector<8x64xf32>
    %137 = math.tanh %136 : vector<8x64xf32>
    %138 = vector.extract_strided_slice %135 {offsets = [0, 0], sizes = [8, 64], strides = [1, 1]} : vector<8x192xf32> to vector<8x64xf32>
    %139 = vector.extract_strided_slice %135 {offsets = [0, 64], sizes = [8, 64], strides = [1, 1]} : vector<8x192xf32> to vector<8x64xf32>
    %140 = vector.extract_strided_slice %135 {offsets = [0, 128], sizes = [8, 64], strides = [1, 1]} : vector<8x192xf32> to vector<8x64xf32>
    %141 = arith.mulf %139, %119 : vector<8x64xf32>
    %142 = arith.mulf %138, %137 : vector<8x64xf32>
    %143 = arith.addf %141, %142 : vector<8x64xf32>
    %144 = math.tanh %143 : vector<8x64xf32>
    %145 = arith.mulf %140, %144 : vector<8x64xf32>
    %146 = vector.extract_strided_slice %145 {offsets = [0, 32], sizes = [8, 32], strides = [1, 1]} : vector<8x64xf32> to vector<8x32xf32>
    %cst_40 = arith.constant dense<0.000000e+00> : vector<8x128xf32>
    %147 = tpu.matmul %146, %3, %cst_40 {dimension_numbers = #tpu.dot_dimension_numbers<[1], [0], [0], [1], [0, 0, 1, 1], [], []>} : vector<8x32xf32>, vector<32x128xf32>, vector<8x128xf32> -> vector<8x128xf32>
    %148 = vector.broadcast %4 : vector<1x128xf32> to vector<8x128xf32>
    %149 = arith.addf %147, %148 : vector<8x128xf32>
    %c0_41 = arith.constant 0 : index
    %c512 = arith.constant 512 : index
    %150 = vector.load %arg2[%c0_41, %c512] : memref<8x1920xf32, #tpu.memory_space<vmem>>, vector<8x128xf32>
    tpu.vector_store %arg2[%c0_41, %c512], %149 {strides = array<i32>} : memref<8x1920xf32, #tpu.memory_space<vmem>>, vector<8x128xf32>,
    %c48 = arith.constant 48 : index
    %c0_42 = arith.constant 0 : index
    %151 = vector.load %arg3[%c48, %c0_42] : memref<120x256xf32, #tpu.memory_space<vmem>>, vector<8x256xf32>
    %cst_43 = arith.constant dense<0.000000e+00> : vector<8x256xf32>
    %152 = tpu.matmul %145, %2, %cst_43 {dimension_numbers = #tpu.dot_dimension_numbers<[1], [0], [0], [1], [0, 0, 1, 1], [], []>} : vector<8x64xf32>, vector<64x256xf32>, vector<8x256xf32> -> vector<8x256xf32>
    %153 = arith.addf %151, %152 : vector<8x256xf32>
    %154 = vector.extract_strided_slice %153 {offsets = [0, 0], sizes = [8, 192], strides = [1, 1]} : vector<8x256xf32> to vector<8x192xf32>
    %155 = arith.negf %154 : vector<8x192xf32>
    %156 = math.exp %155 : vector<8x192xf32>
    %cst_44 = arith.constant 1.000000e+00 : f32
    %157 = vector.broadcast %cst_44 : f32 to vector<8x192xf32>
    %158 = arith.addf %157, %156 : vector<8x192xf32>
    %159 = arith.divf %157, %158 : vector<8x192xf32>
    %160 = vector.extract_strided_slice %153 {offsets = [0, 192], sizes = [8, 64], strides = [1, 1]} : vector<8x256xf32> to vector<8x64xf32>
    %161 = math.tanh %160 : vector<8x64xf32>
    %162 = vector.extract_strided_slice %159 {offsets = [0, 0], sizes = [8, 64], strides = [1, 1]} : vector<8x192xf32> to vector<8x64xf32>
    %163 = vector.extract_strided_slice %159 {offsets = [0, 64], sizes = [8, 64], strides = [1, 1]} : vector<8x192xf32> to vector<8x64xf32>
    %164 = vector.extract_strided_slice %159 {offsets = [0, 128], sizes = [8, 64], strides = [1, 1]} : vector<8x192xf32> to vector<8x64xf32>
    %165 = arith.mulf %163, %143 : vector<8x64xf32>
    %166 = arith.mulf %162, %161 : vector<8x64xf32>
    %167 = arith.addf %165, %166 : vector<8x64xf32>
    %168 = math.tanh %167 : vector<8x64xf32>
    %169 = arith.mulf %164, %168 : vector<8x64xf32>
    %170 = vector.extract_strided_slice %169 {offsets = [0, 32], sizes = [8, 32], strides = [1, 1]} : vector<8x64xf32> to vector<8x32xf32>
    %cst_45 = arith.constant dense<0.000000e+00> : vector<8x128xf32>
    %171 = tpu.matmul %170, %3, %cst_45 {dimension_numbers = #tpu.dot_dimension_numbers<[1], [0], [0], [1], [0, 0, 1, 1], [], []>} : vector<8x32xf32>, vector<32x128xf32>, vector<8x128xf32> -> vector<8x128xf32>
    %172 = vector.broadcast %4 : vector<1x128xf32> to vector<8x128xf32>
    %173 = arith.addf %171, %172 : vector<8x128xf32>
    %c0_46 = arith.constant 0 : index
    %c640 = arith.constant 640 : index
    %174 = vector.load %arg2[%c0_46, %c640] : memref<8x1920xf32, #tpu.memory_space<vmem>>, vector<8x128xf32>
    tpu.vector_store %arg2[%c0_46, %c640], %173 {strides = array<i32>} : memref<8x1920xf32, #tpu.memory_space<vmem>>, vector<8x128xf32>,
    %c56 = arith.constant 56 : index
    %c0_47 = arith.constant 0 : index
    %175 = vector.load %arg3[%c56, %c0_47] : memref<120x256xf32, #tpu.memory_space<vmem>>, vector<8x256xf32>
    %cst_48 = arith.constant dense<0.000000e+00> : vector<8x256xf32>
    %176 = tpu.matmul %169, %2, %cst_48 {dimension_numbers = #tpu.dot_dimension_numbers<[1], [0], [0], [1], [0, 0, 1, 1], [], []>} : vector<8x64xf32>, vector<64x256xf32>, vector<8x256xf32> -> vector<8x256xf32>
    %177 = arith.addf %175, %176 : vector<8x256xf32>
    %178 = vector.extract_strided_slice %177 {offsets = [0, 0], sizes = [8, 192], strides = [1, 1]} : vector<8x256xf32> to vector<8x192xf32>
    %179 = arith.negf %178 : vector<8x192xf32>
    %180 = math.exp %179 : vector<8x192xf32>
    %cst_49 = arith.constant 1.000000e+00 : f32
    %181 = vector.broadcast %cst_49 : f32 to vector<8x192xf32>
    %182 = arith.addf %181, %180 : vector<8x192xf32>
    %183 = arith.divf %181, %182 : vector<8x192xf32>
    %184 = vector.extract_strided_slice %177 {offsets = [0, 192], sizes = [8, 64], strides = [1, 1]} : vector<8x256xf32> to vector<8x64xf32>
    %185 = math.tanh %184 : vector<8x64xf32>
    %186 = vector.extract_strided_slice %183 {offsets = [0, 0], sizes = [8, 64], strides = [1, 1]} : vector<8x192xf32> to vector<8x64xf32>
    %187 = vector.extract_strided_slice %183 {offsets = [0, 64], sizes = [8, 64], strides = [1, 1]} : vector<8x192xf32> to vector<8x64xf32>
    %188 = vector.extract_strided_slice %183 {offsets = [0, 128], sizes = [8, 64], strides = [1, 1]} : vector<8x192xf32> to vector<8x64xf32>
    %189 = arith.mulf %187, %167 : vector<8x64xf32>
    %190 = arith.mulf %186, %185 : vector<8x64xf32>
    %191 = arith.addf %189, %190 : vector<8x64xf32>
    %192 = math.tanh %191 : vector<8x64xf32>
    %193 = arith.mulf %188, %192 : vector<8x64xf32>
    %194 = vector.extract_strided_slice %193 {offsets = [0, 32], sizes = [8, 32], strides = [1, 1]} : vector<8x64xf32> to vector<8x32xf32>
    %cst_50 = arith.constant dense<0.000000e+00> : vector<8x128xf32>
    %195 = tpu.matmul %194, %3, %cst_50 {dimension_numbers = #tpu.dot_dimension_numbers<[1], [0], [0], [1], [0, 0, 1, 1], [], []>} : vector<8x32xf32>, vector<32x128xf32>, vector<8x128xf32> -> vector<8x128xf32>
    %196 = vector.broadcast %4 : vector<1x128xf32> to vector<8x128xf32>
    %197 = arith.addf %195, %196 : vector<8x128xf32>
    %c0_51 = arith.constant 0 : index
    %c768 = arith.constant 768 : index
    %198 = vector.load %arg2[%c0_51, %c768] : memref<8x1920xf32, #tpu.memory_space<vmem>>, vector<8x128xf32>
    tpu.vector_store %arg2[%c0_51, %c768], %197 {strides = array<i32>} : memref<8x1920xf32, #tpu.memory_space<vmem>>, vector<8x128xf32>,
    %c64 = arith.constant 64 : index
    %c0_52 = arith.constant 0 : index
    %199 = vector.load %arg3[%c64, %c0_52] : memref<120x256xf32, #tpu.memory_space<vmem>>, vector<8x256xf32>
    %cst_53 = arith.constant dense<0.000000e+00> : vector<8x256xf32>
    %200 = tpu.matmul %193, %2, %cst_53 {dimension_numbers = #tpu.dot_dimension_numbers<[1], [0], [0], [1], [0, 0, 1, 1], [], []>} : vector<8x64xf32>, vector<64x256xf32>, vector<8x256xf32> -> vector<8x256xf32>
    %201 = arith.addf %199, %200 : vector<8x256xf32>
    %202 = vector.extract_strided_slice %201 {offsets = [0, 0], sizes = [8, 192], strides = [1, 1]} : vector<8x256xf32> to vector<8x192xf32>
    %203 = arith.negf %202 : vector<8x192xf32>
    %204 = math.exp %203 : vector<8x192xf32>
    %cst_54 = arith.constant 1.000000e+00 : f32
    %205 = vector.broadcast %cst_54 : f32 to vector<8x192xf32>
    %206 = arith.addf %205, %204 : vector<8x192xf32>
    %207 = arith.divf %205, %206 : vector<8x192xf32>
    %208 = vector.extract_strided_slice %201 {offsets = [0, 192], sizes = [8, 64], strides = [1, 1]} : vector<8x256xf32> to vector<8x64xf32>
    %209 = math.tanh %208 : vector<8x64xf32>
    %210 = vector.extract_strided_slice %207 {offsets = [0, 0], sizes = [8, 64], strides = [1, 1]} : vector<8x192xf32> to vector<8x64xf32>
    %211 = vector.extract_strided_slice %207 {offsets = [0, 64], sizes = [8, 64], strides = [1, 1]} : vector<8x192xf32> to vector<8x64xf32>
    %212 = vector.extract_strided_slice %207 {offsets = [0, 128], sizes = [8, 64], strides = [1, 1]} : vector<8x192xf32> to vector<8x64xf32>
    %213 = arith.mulf %211, %191 : vector<8x64xf32>
    %214 = arith.mulf %210, %209 : vector<8x64xf32>
    %215 = arith.addf %213, %214 : vector<8x64xf32>
    %216 = math.tanh %215 : vector<8x64xf32>
    %217 = arith.mulf %212, %216 : vector<8x64xf32>
    %218 = vector.extract_strided_slice %217 {offsets = [0, 32], sizes = [8, 32], strides = [1, 1]} : vector<8x64xf32> to vector<8x32xf32>
    %cst_55 = arith.constant dense<0.000000e+00> : vector<8x128xf32>
    %219 = tpu.matmul %218, %3, %cst_55 {dimension_numbers = #tpu.dot_dimension_numbers<[1], [0], [0], [1], [0, 0, 1, 1], [], []>} : vector<8x32xf32>, vector<32x128xf32>, vector<8x128xf32> -> vector<8x128xf32>
    %220 = vector.broadcast %4 : vector<1x128xf32> to vector<8x128xf32>
    %221 = arith.addf %219, %220 : vector<8x128xf32>
    %c0_56 = arith.constant 0 : index
    %c896 = arith.constant 896 : index
    %222 = vector.load %arg2[%c0_56, %c896] : memref<8x1920xf32, #tpu.memory_space<vmem>>, vector<8x128xf32>
    tpu.vector_store %arg2[%c0_56, %c896], %221 {strides = array<i32>} : memref<8x1920xf32, #tpu.memory_space<vmem>>, vector<8x128xf32>,
    %c72 = arith.constant 72 : index
    %c0_57 = arith.constant 0 : index
    %223 = vector.load %arg3[%c72, %c0_57] : memref<120x256xf32, #tpu.memory_space<vmem>>, vector<8x256xf32>
    %cst_58 = arith.constant dense<0.000000e+00> : vector<8x256xf32>
    %224 = tpu.matmul %217, %2, %cst_58 {dimension_numbers = #tpu.dot_dimension_numbers<[1], [0], [0], [1], [0, 0, 1, 1], [], []>} : vector<8x64xf32>, vector<64x256xf32>, vector<8x256xf32> -> vector<8x256xf32>
    %225 = arith.addf %223, %224 : vector<8x256xf32>
    %226 = vector.extract_strided_slice %225 {offsets = [0, 0], sizes = [8, 192], strides = [1, 1]} : vector<8x256xf32> to vector<8x192xf32>
    %227 = arith.negf %226 : vector<8x192xf32>
    %228 = math.exp %227 : vector<8x192xf32>
    %cst_59 = arith.constant 1.000000e+00 : f32
    %229 = vector.broadcast %cst_59 : f32 to vector<8x192xf32>
    %230 = arith.addf %229, %228 : vector<8x192xf32>
    %231 = arith.divf %229, %230 : vector<8x192xf32>
    %232 = vector.extract_strided_slice %225 {offsets = [0, 192], sizes = [8, 64], strides = [1, 1]} : vector<8x256xf32> to vector<8x64xf32>
    %233 = math.tanh %232 : vector<8x64xf32>
    %234 = vector.extract_strided_slice %231 {offsets = [0, 0], sizes = [8, 64], strides = [1, 1]} : vector<8x192xf32> to vector<8x64xf32>
    %235 = vector.extract_strided_slice %231 {offsets = [0, 64], sizes = [8, 64], strides = [1, 1]} : vector<8x192xf32> to vector<8x64xf32>
    %236 = vector.extract_strided_slice %231 {offsets = [0, 128], sizes = [8, 64], strides = [1, 1]} : vector<8x192xf32> to vector<8x64xf32>
    %237 = arith.mulf %235, %215 : vector<8x64xf32>
    %238 = arith.mulf %234, %233 : vector<8x64xf32>
    %239 = arith.addf %237, %238 : vector<8x64xf32>
    %240 = math.tanh %239 : vector<8x64xf32>
    %241 = arith.mulf %236, %240 : vector<8x64xf32>
    %242 = vector.extract_strided_slice %241 {offsets = [0, 32], sizes = [8, 32], strides = [1, 1]} : vector<8x64xf32> to vector<8x32xf32>
    %cst_60 = arith.constant dense<0.000000e+00> : vector<8x128xf32>
    %243 = tpu.matmul %242, %3, %cst_60 {dimension_numbers = #tpu.dot_dimension_numbers<[1], [0], [0], [1], [0, 0, 1, 1], [], []>} : vector<8x32xf32>, vector<32x128xf32>, vector<8x128xf32> -> vector<8x128xf32>
    %244 = vector.broadcast %4 : vector<1x128xf32> to vector<8x128xf32>
    %245 = arith.addf %243, %244 : vector<8x128xf32>
    %c0_61 = arith.constant 0 : index
    %c1024 = arith.constant 1024 : index
    %246 = vector.load %arg2[%c0_61, %c1024] : memref<8x1920xf32, #tpu.memory_space<vmem>>, vector<8x128xf32>
    tpu.vector_store %arg2[%c0_61, %c1024], %245 {strides = array<i32>} : memref<8x1920xf32, #tpu.memory_space<vmem>>, vector<8x128xf32>,
    %c80_62 = arith.constant 80 : index
    %c0_63 = arith.constant 0 : index
    %247 = vector.load %arg3[%c80_62, %c0_63] : memref<120x256xf32, #tpu.memory_space<vmem>>, vector<8x256xf32>
    %cst_64 = arith.constant dense<0.000000e+00> : vector<8x256xf32>
    %248 = tpu.matmul %241, %2, %cst_64 {dimension_numbers = #tpu.dot_dimension_numbers<[1], [0], [0], [1], [0, 0, 1, 1], [], []>} : vector<8x64xf32>, vector<64x256xf32>, vector<8x256xf32> -> vector<8x256xf32>
    %249 = arith.addf %247, %248 : vector<8x256xf32>
    %250 = vector.extract_strided_slice %249 {offsets = [0, 0], sizes = [8, 192], strides = [1, 1]} : vector<8x256xf32> to vector<8x192xf32>
    %251 = arith.negf %250 : vector<8x192xf32>
    %252 = math.exp %251 : vector<8x192xf32>
    %cst_65 = arith.constant 1.000000e+00 : f32
    %253 = vector.broadcast %cst_65 : f32 to vector<8x192xf32>
    %254 = arith.addf %253, %252 : vector<8x192xf32>
    %255 = arith.divf %253, %254 : vector<8x192xf32>
    %256 = vector.extract_strided_slice %249 {offsets = [0, 192], sizes = [8, 64], strides = [1, 1]} : vector<8x256xf32> to vector<8x64xf32>
    %257 = math.tanh %256 : vector<8x64xf32>
    %258 = vector.extract_strided_slice %255 {offsets = [0, 0], sizes = [8, 64], strides = [1, 1]} : vector<8x192xf32> to vector<8x64xf32>
    %259 = vector.extract_strided_slice %255 {offsets = [0, 64], sizes = [8, 64], strides = [1, 1]} : vector<8x192xf32> to vector<8x64xf32>
    %260 = vector.extract_strided_slice %255 {offsets = [0, 128], sizes = [8, 64], strides = [1, 1]} : vector<8x192xf32> to vector<8x64xf32>
    %261 = arith.mulf %259, %239 : vector<8x64xf32>
    %262 = arith.mulf %258, %257 : vector<8x64xf32>
    %263 = arith.addf %261, %262 : vector<8x64xf32>
    %264 = math.tanh %263 : vector<8x64xf32>
    %265 = arith.mulf %260, %264 : vector<8x64xf32>
    %266 = vector.extract_strided_slice %265 {offsets = [0, 32], sizes = [8, 32], strides = [1, 1]} : vector<8x64xf32> to vector<8x32xf32>
    %cst_66 = arith.constant dense<0.000000e+00> : vector<8x128xf32>
    %267 = tpu.matmul %266, %3, %cst_66 {dimension_numbers = #tpu.dot_dimension_numbers<[1], [0], [0], [1], [0, 0, 1, 1], [], []>} : vector<8x32xf32>, vector<32x128xf32>, vector<8x128xf32> -> vector<8x128xf32>
    %268 = vector.broadcast %4 : vector<1x128xf32> to vector<8x128xf32>
    %269 = arith.addf %267, %268 : vector<8x128xf32>
    %c0_67 = arith.constant 0 : index
    %c1152 = arith.constant 1152 : index
    %270 = vector.load %arg2[%c0_67, %c1152] : memref<8x1920xf32, #tpu.memory_space<vmem>>, vector<8x128xf32>
    tpu.vector_store %arg2[%c0_67, %c1152], %269 {strides = array<i32>} : memref<8x1920xf32, #tpu.memory_space<vmem>>, vector<8x128xf32>,
    %c88 = arith.constant 88 : index
    %c0_68 = arith.constant 0 : index
    %271 = vector.load %arg3[%c88, %c0_68] : memref<120x256xf32, #tpu.memory_space<vmem>>, vector<8x256xf32>
    %cst_69 = arith.constant dense<0.000000e+00> : vector<8x256xf32>
    %272 = tpu.matmul %265, %2, %cst_69 {dimension_numbers = #tpu.dot_dimension_numbers<[1], [0], [0], [1], [0, 0, 1, 1], [], []>} : vector<8x64xf32>, vector<64x256xf32>, vector<8x256xf32> -> vector<8x256xf32>
    %273 = arith.addf %271, %272 : vector<8x256xf32>
    %274 = vector.extract_strided_slice %273 {offsets = [0, 0], sizes = [8, 192], strides = [1, 1]} : vector<8x256xf32> to vector<8x192xf32>
    %275 = arith.negf %274 : vector<8x192xf32>
    %276 = math.exp %275 : vector<8x192xf32>
    %cst_70 = arith.constant 1.000000e+00 : f32
    %277 = vector.broadcast %cst_70 : f32 to vector<8x192xf32>
    %278 = arith.addf %277, %276 : vector<8x192xf32>
    %279 = arith.divf %277, %278 : vector<8x192xf32>
    %280 = vector.extract_strided_slice %273 {offsets = [0, 192], sizes = [8, 64], strides = [1, 1]} : vector<8x256xf32> to vector<8x64xf32>
    %281 = math.tanh %280 : vector<8x64xf32>
    %282 = vector.extract_strided_slice %279 {offsets = [0, 0], sizes = [8, 64], strides = [1, 1]} : vector<8x192xf32> to vector<8x64xf32>
    %283 = vector.extract_strided_slice %279 {offsets = [0, 64], sizes = [8, 64], strides = [1, 1]} : vector<8x192xf32> to vector<8x64xf32>
    %284 = vector.extract_strided_slice %279 {offsets = [0, 128], sizes = [8, 64], strides = [1, 1]} : vector<8x192xf32> to vector<8x64xf32>
    %285 = arith.mulf %283, %263 : vector<8x64xf32>
    %286 = arith.mulf %282, %281 : vector<8x64xf32>
    %287 = arith.addf %285, %286 : vector<8x64xf32>
    %288 = math.tanh %287 : vector<8x64xf32>
    %289 = arith.mulf %284, %288 : vector<8x64xf32>
    %290 = vector.extract_strided_slice %289 {offsets = [0, 32], sizes = [8, 32], strides = [1, 1]} : vector<8x64xf32> to vector<8x32xf32>
    %cst_71 = arith.constant dense<0.000000e+00> : vector<8x128xf32>
    %291 = tpu.matmul %290, %3, %cst_71 {dimension_numbers = #tpu.dot_dimension_numbers<[1], [0], [0], [1], [0, 0, 1, 1], [], []>} : vector<8x32xf32>, vector<32x128xf32>, vector<8x128xf32> -> vector<8x128xf32>
    %292 = vector.broadcast %4 : vector<1x128xf32> to vector<8x128xf32>
    %293 = arith.addf %291, %292 : vector<8x128xf32>
    %c0_72 = arith.constant 0 : index
    %c1280 = arith.constant 1280 : index
    %294 = vector.load %arg2[%c0_72, %c1280] : memref<8x1920xf32, #tpu.memory_space<vmem>>, vector<8x128xf32>
    tpu.vector_store %arg2[%c0_72, %c1280], %293 {strides = array<i32>} : memref<8x1920xf32, #tpu.memory_space<vmem>>, vector<8x128xf32>,
    %c96 = arith.constant 96 : index
    %c0_73 = arith.constant 0 : index
    %295 = vector.load %arg3[%c96, %c0_73] : memref<120x256xf32, #tpu.memory_space<vmem>>, vector<8x256xf32>
    %cst_74 = arith.constant dense<0.000000e+00> : vector<8x256xf32>
    %296 = tpu.matmul %289, %2, %cst_74 {dimension_numbers = #tpu.dot_dimension_numbers<[1], [0], [0], [1], [0, 0, 1, 1], [], []>} : vector<8x64xf32>, vector<64x256xf32>, vector<8x256xf32> -> vector<8x256xf32>
    %297 = arith.addf %295, %296 : vector<8x256xf32>
    %298 = vector.extract_strided_slice %297 {offsets = [0, 0], sizes = [8, 192], strides = [1, 1]} : vector<8x256xf32> to vector<8x192xf32>
    %299 = arith.negf %298 : vector<8x192xf32>
    %300 = math.exp %299 : vector<8x192xf32>
    %cst_75 = arith.constant 1.000000e+00 : f32
    %301 = vector.broadcast %cst_75 : f32 to vector<8x192xf32>
    %302 = arith.addf %301, %300 : vector<8x192xf32>
    %303 = arith.divf %301, %302 : vector<8x192xf32>
    %304 = vector.extract_strided_slice %297 {offsets = [0, 192], sizes = [8, 64], strides = [1, 1]} : vector<8x256xf32> to vector<8x64xf32>
    %305 = math.tanh %304 : vector<8x64xf32>
    %306 = vector.extract_strided_slice %303 {offsets = [0, 0], sizes = [8, 64], strides = [1, 1]} : vector<8x192xf32> to vector<8x64xf32>
    %307 = vector.extract_strided_slice %303 {offsets = [0, 64], sizes = [8, 64], strides = [1, 1]} : vector<8x192xf32> to vector<8x64xf32>
    %308 = vector.extract_strided_slice %303 {offsets = [0, 128], sizes = [8, 64], strides = [1, 1]} : vector<8x192xf32> to vector<8x64xf32>
    %309 = arith.mulf %307, %287 : vector<8x64xf32>
    %310 = arith.mulf %306, %305 : vector<8x64xf32>
    %311 = arith.addf %309, %310 : vector<8x64xf32>
    %312 = math.tanh %311 : vector<8x64xf32>
    %313 = arith.mulf %308, %312 : vector<8x64xf32>
    %314 = vector.extract_strided_slice %313 {offsets = [0, 32], sizes = [8, 32], strides = [1, 1]} : vector<8x64xf32> to vector<8x32xf32>
    %cst_76 = arith.constant dense<0.000000e+00> : vector<8x128xf32>
    %315 = tpu.matmul %314, %3, %cst_76 {dimension_numbers = #tpu.dot_dimension_numbers<[1], [0], [0], [1], [0, 0, 1, 1], [], []>} : vector<8x32xf32>, vector<32x128xf32>, vector<8x128xf32> -> vector<8x128xf32>
    %316 = vector.broadcast %4 : vector<1x128xf32> to vector<8x128xf32>
    %317 = arith.addf %315, %316 : vector<8x128xf32>
    %c0_77 = arith.constant 0 : index
    %c1408 = arith.constant 1408 : index
    %318 = vector.load %arg2[%c0_77, %c1408] : memref<8x1920xf32, #tpu.memory_space<vmem>>, vector<8x128xf32>
    tpu.vector_store %arg2[%c0_77, %c1408], %317 {strides = array<i32>} : memref<8x1920xf32, #tpu.memory_space<vmem>>, vector<8x128xf32>,
    %c104 = arith.constant 104 : index
    %c0_78 = arith.constant 0 : index
    %319 = vector.load %arg3[%c104, %c0_78] : memref<120x256xf32, #tpu.memory_space<vmem>>, vector<8x256xf32>
    %cst_79 = arith.constant dense<0.000000e+00> : vector<8x256xf32>
    %320 = tpu.matmul %313, %2, %cst_79 {dimension_numbers = #tpu.dot_dimension_numbers<[1], [0], [0], [1], [0, 0, 1, 1], [], []>} : vector<8x64xf32>, vector<64x256xf32>, vector<8x256xf32> -> vector<8x256xf32>
    %321 = arith.addf %319, %320 : vector<8x256xf32>
    %322 = vector.extract_strided_slice %321 {offsets = [0, 0], sizes = [8, 192], strides = [1, 1]} : vector<8x256xf32> to vector<8x192xf32>
    %323 = arith.negf %322 : vector<8x192xf32>
    %324 = math.exp %323 : vector<8x192xf32>
    %cst_80 = arith.constant 1.000000e+00 : f32
    %325 = vector.broadcast %cst_80 : f32 to vector<8x192xf32>
    %326 = arith.addf %325, %324 : vector<8x192xf32>
    %327 = arith.divf %325, %326 : vector<8x192xf32>
    %328 = vector.extract_strided_slice %321 {offsets = [0, 192], sizes = [8, 64], strides = [1, 1]} : vector<8x256xf32> to vector<8x64xf32>
    %329 = math.tanh %328 : vector<8x64xf32>
    %330 = vector.extract_strided_slice %327 {offsets = [0, 0], sizes = [8, 64], strides = [1, 1]} : vector<8x192xf32> to vector<8x64xf32>
    %331 = vector.extract_strided_slice %327 {offsets = [0, 64], sizes = [8, 64], strides = [1, 1]} : vector<8x192xf32> to vector<8x64xf32>
    %332 = vector.extract_strided_slice %327 {offsets = [0, 128], sizes = [8, 64], strides = [1, 1]} : vector<8x192xf32> to vector<8x64xf32>
    %333 = arith.mulf %331, %311 : vector<8x64xf32>
    %334 = arith.mulf %330, %329 : vector<8x64xf32>
    %335 = arith.addf %333, %334 : vector<8x64xf32>
    %336 = math.tanh %335 : vector<8x64xf32>
    %337 = arith.mulf %332, %336 : vector<8x64xf32>
    %338 = vector.extract_strided_slice %337 {offsets = [0, 32], sizes = [8, 32], strides = [1, 1]} : vector<8x64xf32> to vector<8x32xf32>
    %cst_81 = arith.constant dense<0.000000e+00> : vector<8x128xf32>
    %339 = tpu.matmul %338, %3, %cst_81 {dimension_numbers = #tpu.dot_dimension_numbers<[1], [0], [0], [1], [0, 0, 1, 1], [], []>} : vector<8x32xf32>, vector<32x128xf32>, vector<8x128xf32> -> vector<8x128xf32>
    %340 = vector.broadcast %4 : vector<1x128xf32> to vector<8x128xf32>
    %341 = arith.addf %339, %340 : vector<8x128xf32>
    %c0_82 = arith.constant 0 : index
    %c1536 = arith.constant 1536 : index
    %342 = vector.load %arg2[%c0_82, %c1536] : memref<8x1920xf32, #tpu.memory_space<vmem>>, vector<8x128xf32>
    tpu.vector_store %arg2[%c0_82, %c1536], %341 {strides = array<i32>} : memref<8x1920xf32, #tpu.memory_space<vmem>>, vector<8x128xf32>,
    %c112_83 = arith.constant 112 : index
    %c0_84 = arith.constant 0 : index
    %343 = vector.load %arg3[%c112_83, %c0_84] : memref<120x256xf32, #tpu.memory_space<vmem>>, vector<8x256xf32>
    %cst_85 = arith.constant dense<0.000000e+00> : vector<8x256xf32>
    %344 = tpu.matmul %337, %2, %cst_85 {dimension_numbers = #tpu.dot_dimension_numbers<[1], [0], [0], [1], [0, 0, 1, 1], [], []>} : vector<8x64xf32>, vector<64x256xf32>, vector<8x256xf32> -> vector<8x256xf32>
    %345 = arith.addf %343, %344 : vector<8x256xf32>
    %346 = vector.extract_strided_slice %345 {offsets = [0, 0], sizes = [8, 192], strides = [1, 1]} : vector<8x256xf32> to vector<8x192xf32>
    %347 = arith.negf %346 : vector<8x192xf32>
    %348 = math.exp %347 : vector<8x192xf32>
    %cst_86 = arith.constant 1.000000e+00 : f32
    %349 = vector.broadcast %cst_86 : f32 to vector<8x192xf32>
    %350 = arith.addf %349, %348 : vector<8x192xf32>
    %351 = arith.divf %349, %350 : vector<8x192xf32>
    %352 = vector.extract_strided_slice %345 {offsets = [0, 192], sizes = [8, 64], strides = [1, 1]} : vector<8x256xf32> to vector<8x64xf32>
    %353 = math.tanh %352 : vector<8x64xf32>
    %354 = vector.extract_strided_slice %351 {offsets = [0, 0], sizes = [8, 64], strides = [1, 1]} : vector<8x192xf32> to vector<8x64xf32>
    %355 = vector.extract_strided_slice %351 {offsets = [0, 64], sizes = [8, 64], strides = [1, 1]} : vector<8x192xf32> to vector<8x64xf32>
    %356 = vector.extract_strided_slice %351 {offsets = [0, 128], sizes = [8, 64], strides = [1, 1]} : vector<8x192xf32> to vector<8x64xf32>
    %357 = arith.mulf %355, %335 : vector<8x64xf32>
    %358 = arith.mulf %354, %353 : vector<8x64xf32>
    %359 = arith.addf %357, %358 : vector<8x64xf32>
    %360 = math.tanh %359 : vector<8x64xf32>
    %361 = arith.mulf %356, %360 : vector<8x64xf32>
    %362 = vector.extract_strided_slice %361 {offsets = [0, 32], sizes = [8, 32], strides = [1, 1]} : vector<8x64xf32> to vector<8x32xf32>
    %cst_87 = arith.constant dense<0.000000e+00> : vector<8x128xf32>
    %363 = tpu.matmul %362, %3, %cst_87 {dimension_numbers = #tpu.dot_dimension_numbers<[1], [0], [0], [1], [0, 0, 1, 1], [], []>} : vector<8x32xf32>, vector<32x128xf32>, vector<8x128xf32> -> vector<8x128xf32>
    %364 = vector.broadcast %4 : vector<1x128xf32> to vector<8x128xf32>
    %365 = arith.addf %363, %364 : vector<8x128xf32>
    %c0_88 = arith.constant 0 : index
    %c1664 = arith.constant 1664 : index
    %366 = vector.load %arg2[%c0_88, %c1664] : memref<8x1920xf32, #tpu.memory_space<vmem>>, vector<8x128xf32>
    tpu.vector_store %arg2[%c0_88, %c1664], %365 {strides = array<i32>} : memref<8x1920xf32, #tpu.memory_space<vmem>>, vector<8x128xf32>,
    %c112_89 = arith.constant 112 : index
    %c0_90 = arith.constant 0 : index
    %367 = vector.load %arg3[%c112_89, %c0_90] : memref<120x256xf32, #tpu.memory_space<vmem>>, vector<8x256xf32>
    %cst_91 = arith.constant dense<0.000000e+00> : vector<8x256xf32>
    %368 = tpu.matmul %361, %2, %cst_91 {dimension_numbers = #tpu.dot_dimension_numbers<[1], [0], [0], [1], [0, 0, 1, 1], [], []>} : vector<8x64xf32>, vector<64x256xf32>, vector<8x256xf32> -> vector<8x256xf32>
    %369 = arith.addf %367, %368 : vector<8x256xf32>
    %370 = vector.extract_strided_slice %369 {offsets = [0, 0], sizes = [8, 192], strides = [1, 1]} : vector<8x256xf32> to vector<8x192xf32>
    %371 = arith.negf %370 : vector<8x192xf32>
    %372 = math.exp %371 : vector<8x192xf32>
    %cst_92 = arith.constant 1.000000e+00 : f32
    %373 = vector.broadcast %cst_92 : f32 to vector<8x192xf32>
    %374 = arith.addf %373, %372 : vector<8x192xf32>
    %375 = arith.divf %373, %374 : vector<8x192xf32>
    %376 = vector.extract_strided_slice %369 {offsets = [0, 192], sizes = [8, 64], strides = [1, 1]} : vector<8x256xf32> to vector<8x64xf32>
    %377 = math.tanh %376 : vector<8x64xf32>
    %378 = vector.extract_strided_slice %375 {offsets = [0, 0], sizes = [8, 64], strides = [1, 1]} : vector<8x192xf32> to vector<8x64xf32>
    %379 = vector.extract_strided_slice %375 {offsets = [0, 64], sizes = [8, 64], strides = [1, 1]} : vector<8x192xf32> to vector<8x64xf32>
    %380 = vector.extract_strided_slice %375 {offsets = [0, 128], sizes = [8, 64], strides = [1, 1]} : vector<8x192xf32> to vector<8x64xf32>
    %381 = arith.mulf %379, %359 : vector<8x64xf32>
    %382 = arith.mulf %378, %377 : vector<8x64xf32>
    %383 = arith.addf %381, %382 : vector<8x64xf32>
    %384 = math.tanh %383 : vector<8x64xf32>
    %385 = arith.mulf %380, %384 : vector<8x64xf32>
    %386 = vector.extract_strided_slice %385 {offsets = [0, 32], sizes = [8, 32], strides = [1, 1]} : vector<8x64xf32> to vector<8x32xf32>
    %cst_93 = arith.constant dense<0.000000e+00> : vector<8x128xf32>
    %387 = tpu.matmul %386, %3, %cst_93 {dimension_numbers = #tpu.dot_dimension_numbers<[1], [0], [0], [1], [0, 0, 1, 1], [], []>} : vector<8x32xf32>, vector<32x128xf32>, vector<8x128xf32> -> vector<8x128xf32>
    %388 = vector.broadcast %4 : vector<1x128xf32> to vector<8x128xf32>
    %389 = arith.addf %387, %388 : vector<8x128xf32>
    %c0_94 = arith.constant 0 : index
    %c1792 = arith.constant 1792 : index
    %390 = vector.load %arg2[%c0_94, %c1792] : memref<8x1920xf32, #tpu.memory_space<vmem>>, vector<8x128xf32>
    tpu.vector_store %arg2[%c0_94, %c1792], %389 {strides = array<i32>} : memref<8x1920xf32, #tpu.memory_space<vmem>>, vector<8x128xf32>,
    return
  }
}

</mosaic_0001>

<bundles_post_ra>
// kernel: mynet_forward.1
= control target key start
LH: loop header
LB: loop body
LE: loop exit
PB: predicated region body
PF: predicated region fallthrough
CT: control target
= control target key end

     0   :  { %v3973_v2 = vmov 0.0   ;;  %vm62_vm0 = vcmask 64512   ;;  %v52_v4 = vlaneseq  ;;  %s3974_s21 = smov 64   ;;  %vm322_vm2 = vcmask 523264   ;;  %s4639_s1 = inlined_call_operand.vmem [shape: f32[120,256], index: 1, kind: input, shape index: {}]   ;;  %s4640_s0 = inlined_call_operand.vmem [shape: f32[120,8], index: 0, kind: input, shape index: {}]   ;;  %s4641_s2 = inlined_call_operand.vmem [shape: f32[8,1920], index: 2, kind: output, shape index: {}]  }
   0x1   :  { %v12_v0 = vld [vmem:[%s4639_s1 + $0x8] sm:$0xff]  ;;  %v11_v1 = vld [vmem:[%s4639_s1] sm:$0xff]  ;;  %172 = vmatprep.mubr.f32.mxu1 %v3973_v2  ;;  %390 = vmatprep.mubr.f32.mxu0 %v3973_v2  ;;  %v3076_v7 = vld [vmem:[%s4639_s1 + $0x10] ss:$8 sm:$0x3]  ;;  %vm3976_vm3 = vmmov 0  }
   0x2   :  { %v36_v3 = vld [vmem:[%s4640_s0] sm:$0xff]  ;;  %108 = vmatprep.subr.mxu1 %v12_v0  ;;  %v53_v5 = vshrl.u32 %v52_v4, 7  ;;  %v16_v10 = vld [vmem:[%s4639_s1 + $0x28] sm:$0xff]  ;;  %v18_v11 = vld [vmem:[%s4639_s1 + $0x38] sm:$0xff]  ;;  %v294_v46 = vand.u32 127, %v52_v4  ;;  %vm436_vm4 = vcmask 261120  }
   0x3   :  { %109 = vmatpush1.msra.mxu1 %v11_v1  ;;  %v4017_v13 = vpack.c.bf16 %v18_v11, %v16_v10  ;;  %v15_v14 = vld [vmem:[%s4639_s1 + $0x20] sm:$0xff]  ;;  %v17_v15 = vld [vmem:[%s4639_s1 + $0x30] sm:$0xff]  ;;  %v20_v18 = vld [vmem:[%s4639_s1 + $0x48] sm:$0xff] }
   0x4   :  { %3077 = vmatmul.mubr.msk.f32.vlgmr.msra.gmra.mrb[0].mxu1 %vm62_vm0, %v36_v3  ;;  %v58_v6 = vsub.s32 1, %v53_v5  ;;  %v4026_v17 = vpack.c.bf16 %v17_v15, %v15_v14  ;;  %v22_v19 = vld [vmem:[%s4639_s1 + $0x58] sm:$0xff]  ;;  %v19_v21 = vld [vmem:[%s4639_s1 + $0x40] sm:$0xff]  ;;  %v21_v22 = vld [vmem:[%s4639_s1 + $0x50] sm:$0xff]  ;;  %v54_v38 = vsub.s32 0, %v53_v5  ;;  %vm295_vm1 = vcmp.lt.s32.totalorder %v294_v46, 32 }
   0x5   :  { %178 = vmatprep.mubr.f32.mxu1 %v3973_v2  ;;  %3395 = vmatprep.subr.bf16.mxu0 %v4017_v13  ;;  %v4036_v20 = vpack.c.bf16 %v22_v19, %v20_v18  ;;  %v4044_v23 = vpack.c.bf16 %v21_v22, %v19_v21  ;;  %v24_v24 = vld [vmem:[%s4639_s1 + $0x68] sm:$0xff]  ;;  %v26_v25 = vld [vmem:[%s4639_s1 + $0x78] sm:$0xff]  ;;  %v23_v27 = vld [vmem:[%s4639_s1 + $0x60] sm:$0xff] }
   0x6   :  { %v4009_v8 = vrot.slane %v3076_v7, %v58_v6  ;;  %3397 = vmatpush1.bf16.msra.mxu0 %v4026_v17  ;;  %v4054_v26 = vpack.c.bf16 %v26_v25, %v24_v24  ;;  %v25_v28 = vld [vmem:[%s4639_s1 + $0x70] sm:$0xff]  ;;  %v28_v30 = vld [vmem:[%s4639_s1 + $0x88] sm:$0xff]  ;;  %v30_v31 = vld [vmem:[%s4639_s1 + $0x98] sm:$0xff]  ;;  %v4091_v39 = vrot.slane %v3076_v7, %v54_v38 }
   0x7   :  { %3399 = vmatprep.subr.bf16.mxu0 %v4036_v20  ;;  %v4062_v29 = vpack.c.bf16 %v25_v28, %v23_v27  ;;  %v4072_v32 = vpack.c.bf16 %v30_v31, %v28_v30  ;;  %v27_v33 = vld [vmem:[%s4639_s1 + $0x80] sm:$0xff]  ;;  %v29_v34 = vld [vmem:[%s4639_s1 + $0x90] sm:$0xff]  ;;  %v37_v37 = vld [vmem:[%s4640_s0 + $0x8] sm:$0xff] }
   0x8   :  { %v4080_v36 = vpack.c.bf16 %v29_v34, %v27_v33  ;;  %3078 = vmatmul.mubr.msk.f32.gmra.mrb[2].mxu1 %vm62_vm0, %v37_v37 }
   0x9   :  { %184 = vmatprep.mubr.f32.mxu1 %v3973_v2 }
   0xa   :  { %3401 = vmatpush1.bf16.msra.mxu0 %v4044_v23 }
   0xb   :  { %3403 = vmatprep.subr.bf16.mxu0 %v4054_v26 }
   0xe   :  { %3405 = vmatpush1.bf16.msra.mxu0 %v4062_v29 }
   0xf   :  { %3407 = vmatprep.subr.bf16.mxu0 %v4072_v32 }
  0x12   :  { %3409 = vmatpush1.bf16.msra.mxu0 %v4080_v36 }
  0x13   :  { %3417 = vmatprep.subr.bf16.mxu0 %v4017_v13 }
  0xd7   :  { %v174_v9 = vpop.f32.mrb[0].mxu1 }
  0xd8   :  { %v176_v12 = vpop.f32.mrb[1].mxu1  ;;  %v175_v40 = vadd.f32 %v174_v9, %v4091_v39  ;;  %v38_v9 = vld [vmem:[%s4640_s0 + $0x10] sm:$0xff] }
  0xd9   :  { %v177_v16 = vadd.f32 %v176_v12, %v4009_v8  ;;  %3079 = vmatmul.mubr.msk.f32.gmra.mrb[4].mxu1 %vm62_vm0, %v38_v9  ;;  %v40_v9 = vld [vmem:[%s4640_s0 + $0x20] sm:$0xff] }
  0xda   :  { %v3092_v41 = vmul.f32 -1.442695, %v175_v40  ;;  %190 = vmatprep.mubr.f32.mxu1 %v3973_v2 }
  0xdb   :  { %3781 = vtanh.f32 %v177_v16  ;;  %v3093_v42 = vmul.f32 -1.442695, %v177_v16  ;;  %v180_v56 = vpop.f32.mrb[2].mxu1 }
  0xdc   :  { %3783 = vpow2.f32 %v3092_v41  ;;  %v182_v57 = vpop.f32.mrb[3].mxu1  ;;  %v181_v58 = vadd.f32 %v180_v56, %v4091_v39 }
  0xdd   :  { %3785 = vpow2.f32 %v3093_v42  ;;  %v183_v59 = vadd.f32 %v182_v57, %v4009_v8 }
  0xe5   :  { %v3782_v35 = vpop.eup %3781 }
  0xe6   :  { %312 = vrot.lane.b32.xlu0 %v3782_v35, %s3974_s21  ;;  %v3784_v43 = vpop.eup %3783 }
  0xe7   :  { %v304_v44 = vadd.f32 1.0, %v3784_v43  ;;  %v3786_v45 = vpop.eup %3785 }
  0xe8   :  { %v305_v47 = vadd.f32 1.0, %v3786_v45  ;;  %v39_v45 = vld [vmem:[%s4640_s0 + $0x18] sm:$0xff] }
  0xe9   :  { %3787 = vrcp.f32 %v304_v44  ;;  %3080 = vmatmul.mubr.msk.f32.gmra.mrb[6].mxu1 %vm62_vm0, %v39_v45  ;;  %v41_v45 = vld [vmem:[%s4640_s0 + $0x28] sm:$0xff] }
  0xea   :  { %3789 = vrcp.f32 %v305_v47  ;;  %196 = vmatprep.mubr.f32.mxu1 %v3973_v2 }
  0xed   :  { %3081 = vmatmul.mubr.msk.f32.gmra.mrb[8].mxu1 %vm62_vm0, %v40_v9 }
  0xee   :  { %202 = vmatprep.mubr.f32.mxu1 %v3973_v2 }
  0xf1   :  { %3082 = vmatmul.mubr.msk.f32.gmra.mrb[10].mxu1 %vm62_vm0, %v41_v45 }
  0xf2   :  { %208 = vmatprep.mubr.f32.mxu1 %v3973_v2 }
  0xf3   :  { %v3788_v48 = vpop.eup %3787 }
  0xf4   :  { %v3790_v52 = vpop.eup %3789 }
 0x158   :  { %v313_v49 = vpop.permute.xlu0 %312 }
 0x159   :  { %v315_v50 = vmul.f32 %v3788_v48, %v313_v49 }
 0x15b   :  { %v316_v51 = vsel %vm295_vm1, %v315_v50, 0.0 }
 0x15c   :  { %413 = vrot.lane.b32.xlu1 %v316_v51, %s3974_s21  ;;  %3791 = vtanh.f32 %v316_v51 }
 0x166   :  { %v3792_v53 = vpop.eup %3791 }
 0x167   :  { %v318_v54 = vmul.f32 %v3792_v53, %v3790_v52 }
 0x169   :  { %v319_v55 = vsel %vm295_vm1, %v318_v54, 0.0 }
 0x16a   :  { %3094 = vmatmul.mubr.msk.f32.vlgmr.msra.gmra.mrb[0].mxu0 %vm322_vm2, %v319_v55 }
 0x16b   :  { %3419 = vmatpush1.bf16.msra.mxu0 %v4026_v17  ;;  %578 = vmatprep.mubr.f32.mxu0 %v3973_v2 }
 0x16c   :  { %3421 = vmatprep.subr.bf16.mxu0 %v4036_v20 }
 0x16f   :  { %3423 = vmatpush1.bf16.msra.mxu0 %v4044_v23 }
 0x170   :  { %3425 = vmatprep.subr.bf16.mxu0 %v4054_v26 }
 0x173   :  { %3427 = vmatpush1.bf16.msra.mxu0 %v4062_v29 }
 0x174   :  { %3429 = vmatprep.subr.bf16.mxu0 %v4072_v32 }
 0x177   :  { %3431 = vmatpush1.bf16.msra.mxu0 %v4080_v36 }
 0x178   :  { %3439 = vmatprep.subr.bf16.mxu0 %v4017_v13 }
 0x1ac   :  { %v186_v18 = vpop.f32.mrb[4].mxu1 }
 0x1ad   :  { %v188_v19 = vpop.f32.mrb[5].mxu1  ;;  %v187_v28 = vadd.f32 %v186_v18, %v4091_v39 }
 0x1ae   :  { %v189_v30 = vadd.f32 %v188_v19, %v4009_v8 }
 0x1bc   :  { %v192_v51 = vpop.f32.mrb[6].mxu1 }
 0x1bd   :  { %v194_v52 = vpop.f32.mrb[7].mxu1 }
 0x1ce   :  { %v414_v10 = vpop.permute.xlu1 %413 }
 0x23d   :  { %v392_v60 = vpop.f32.mrb[0].mxu0 }
 0x23e   :  { %v397_v61 = vadd.f32 %v392_v60, %v181_v58  ;;  %v394_v62 = vpop.f32.mrb[1].mxu0  ;;  %v193_v58 = vadd.f32 %v192_v51, %v4091_v39 }
 0x23f   :  { %v398_v63 = vadd.f32 %v394_v62, %v183_v59  ;;  %v195_v59 = vadd.f32 %v194_v52, %v4009_v8 }
 0x240   :  { %v3095_v1 = vmul.f32 -1.442695, %v397_v61 }
 0x241   :  { %3793 = vtanh.f32 %v398_v63  ;;  %v3096_v16 = vmul.f32 -1.442695, %v398_v63 }
 0x242   :  { %3795 = vpow2.f32 %v3095_v1 }
 0x24b   :  { %v3794_v0 = vpop.eup %3793 }
 0x24c   :  { %418 = vrot.lane.b32.xlu0 %v3794_v0, %s3974_s21  ;;  %v3796_v3 = vpop.eup %3795 }
 0x24d   :  { %v405_v4 = vadd.f32 1.0, %v3796_v3 }
 0x24f   :  { %3797 = vrcp.f32 %v405_v4 }
 0x259   :  { %v3798_v5 = vpop.eup %3797 }
 0x25a   :  { %v416_v11 = vmul.f32 %v3798_v5, %v414_v10 }
 0x2be   :  { %v419_v6 = vpop.permute.xlu0 %418 }
 0x2bf   :  { %v421_v7 = vmul.f32 %v3798_v5, %v419_v6 }
 0x2c1   :  { %423 = vrot.lane.b32.xlu1 %v421_v7, %s3974_s21 }
 0x333   :  { %v424_v12 = vpop.permute.xlu1 %423 }
 0x334   :  { %v426_v14 = vadd.f32 %v424_v12, %v416_v11 }
 0x336   :  { %3799 = vtanh.f32 %v426_v14 }
 0x337   :  { %3801 = vpow2.f32 %v3096_v16  ;;  %v198_v16 = vpop.f32.mrb[8].mxu1 }
 0x338   :  { %v200_v18 = vpop.f32.mrb[9].mxu1 }
 0x339   :  { %v204_v51 = vpop.f32.mrb[10].mxu1 }
 0x33a   :  { %v206_v52 = vpop.f32.mrb[11].mxu1 }
 0x340   :  { %v3800_v15 = vpop.eup %3799 }
 0x341   :  { %429 = vrot.lane.b32.xlu0 %v3800_v15, %s3974_s21  ;;  %v3802_v21 = vpop.eup %3801 }
 0x342   :  { %v406_v22 = vadd.f32 1.0, %v3802_v21 }
 0x344   :  { %3803 = vrcp.f32 %v406_v22 }
 0x34e   :  { %v3804_v24 = vpop.eup %3803 }
 0x3b3   :  { %v430_v25 = vpop.permute.xlu0 %429 }
 0x3b4   :  { %v4115_v27 = vmul.f32 %v3804_v24, %v430_v25 }
 0x3b6   :  { %3098 = vmatmul.mubr.msk.f32.vlgmr.msra.gmra.mrb[2].mxu0 %vm322_vm2, %v4115_v27 }
 0x3b7   :  { %3441 = vmatpush1.bf16.msra.mxu0 %v4026_v17  ;;  %761 = vmatprep.mubr.f32.mxu0 %v3973_v2 }
 0x3b8   :  { %3443 = vmatprep.subr.bf16.mxu0 %v4036_v20 }
 0x3bb   :  { %3445 = vmatpush1.bf16.msra.mxu0 %v4044_v23 }
 0x3bc   :  { %3447 = vmatprep.subr.bf16.mxu0 %v4054_v26 }
 0x3bf   :  { %3449 = vmatpush1.bf16.msra.mxu0 %v4062_v29 }
 0x3c0   :  { %3451 = vmatprep.subr.bf16.mxu0 %v4072_v32 }
 0x3c3   :  { %3453 = vmatpush1.bf16.msra.mxu0 %v4080_v36 }
 0x3c4   :  { %3461 = vmatprep.subr.bf16.mxu0 %v4017_v13 }
 0x489   :  { %v580_v31 = vpop.f32.mrb[2].mxu0 }
 0x48a   :  { %v585_v33 = vadd.f32 %v580_v31, %v187_v28  ;;  %v582_v34 = vpop.f32.mrb[3].mxu0  ;;  %v199_v28 = vadd.f32 %v198_v16, %v4091_v39 }
 0x48b   :  { %v586_v35 = vadd.f32 %v582_v34, %v189_v30  ;;  %v201_v30 = vadd.f32 %v200_v18, %v4009_v8 }
 0x48c   :  { %v3099_v38 = vmul.f32 -1.442695, %v585_v33 }
 0x48d   :  { %3805 = vtanh.f32 %v586_v35  ;;  %v3100_v50 = vmul.f32 -1.442695, %v586_v35 }
 0x48e   :  { %3807 = vpow2.f32 %v3099_v38 }
 0x497   :  { %v3806_v37 = vpop.eup %3805 }
 0x498   :  { %602 = vrot.lane.b32.xlu1 %v3806_v37, %s3974_s21  ;;  %v3808_v40 = vpop.eup %3807 }
 0x499   :  { %v593_v41 = vadd.f32 1.0, %v3808_v40 }
 0x49b   :  { %3809 = vrcp.f32 %v593_v41 }
 0x4a5   :  { %v3810_v42 = vpop.eup %3809 }
 0x4a6   :  { %v600_v46 = vmul.f32 %v3810_v42, %v426_v14 }
 0x50a   :  { %v603_v43 = vpop.permute.xlu1 %602 }
 0x50b   :  { %v605_v44 = vmul.f32 %v3810_v42, %v603_v43 }
 0x50d   :  { %607 = vrot.lane.b32.xlu0 %v605_v44, %s3974_s21 }
 0x57f   :  { %v608_v47 = vpop.permute.xlu0 %607 }
 0x580   :  { %v610_v48 = vadd.f32 %v608_v47, %v600_v46 }
 0x582   :  { %3811 = vtanh.f32 %v610_v48 }
 0x583   :  { %3813 = vpow2.f32 %v3100_v50 }
 0x58c   :  { %v3812_v49 = vpop.eup %3811 }
 0x58d   :  { %613 = vrot.lane.b32.xlu1 %v3812_v49, %s3974_s21  ;;  %v3814_v53 = vpop.eup %3813 }
 0x58e   :  { %v594_v54 = vadd.f32 1.0, %v3814_v53 }
 0x590   :  { %3815 = vrcp.f32 %v594_v54 }
 0x59a   :  { %v3816_v55 = vpop.eup %3815 }
 0x5ff   :  { %v614_v56 = vpop.permute.xlu1 %613 }
 0x600   :  { %v4138_v57 = vmul.f32 %v3816_v55, %v614_v56 }
 0x602   :  { %3102 = vmatmul.mubr.msk.f32.vlgmr.msra.gmra.mrb[4].mxu0 %vm322_vm2, %v4138_v57 }
 0x603   :  { %3463 = vmatpush1.bf16.msra.mxu0 %v4026_v17  ;;  %944 = vmatprep.mubr.f32.mxu0 %v3973_v2 }
 0x604   :  { %3465 = vmatprep.subr.bf16.mxu0 %v4036_v20 }
 0x607   :  { %3467 = vmatpush1.bf16.msra.mxu0 %v4044_v23 }
 0x608   :  { %3469 = vmatprep.subr.bf16.mxu0 %v4054_v26 }
 0x60b   :  { %3471 = vmatpush1.bf16.msra.mxu0 %v4062_v29 }
 0x60c   :  { %3473 = vmatprep.subr.bf16.mxu0 %v4072_v32 }
 0x60f   :  { %3475 = vmatpush1.bf16.msra.mxu0 %v4080_v36 }
 0x610   :  { %3483 = vmatprep.subr.bf16.mxu0 %v4017_v13 }
 0x6d5   :  { %v763_v60 = vpop.f32.mrb[4].mxu0 }
 0x6d6   :  { %v768_v61 = vadd.f32 %v763_v60, %v193_v58  ;;  %v765_v62 = vpop.f32.mrb[5].mxu0  ;;  %v207_v60 = vadd.f32 %v206_v52, %v4009_v8 }
 0x6d7   :  { %v769_v63 = vadd.f32 %v765_v62, %v195_v59  ;;  %v205_v59 = vadd.f32 %v204_v51, %v4091_v39 }
 0x6d8   :  { %v3103_v1 = vmul.f32 -1.442695, %v768_v61 }
 0x6d9   :  { %3817 = vtanh.f32 %v769_v63  ;;  %v3104_v15 = vmul.f32 -1.442695, %v769_v63 }
 0x6da   :  { %3819 = vpow2.f32 %v3103_v1 }
 0x6e3   :  { %v3818_v0 = vpop.eup %3817 }
 0x6e4   :  { %785 = vrot.lane.b32.xlu0 %v3818_v0, %s3974_s21  ;;  %v3820_v3 = vpop.eup %3819 }
 0x6e5   :  { %v776_v4 = vadd.f32 1.0, %v3820_v3 }
 0x6e7   :  { %3821 = vrcp.f32 %v776_v4 }
 0x6f1   :  { %v3822_v5 = vpop.eup %3821 }
 0x6f2   :  { %v783_v10 = vmul.f32 %v3822_v5, %v610_v48 }
 0x756   :  { %v786_v6 = vpop.permute.xlu0 %785 }
 0x757   :  { %v788_v7 = vmul.f32 %v3822_v5, %v786_v6 }
 0x759   :  { %790 = vrot.lane.b32.xlu1 %v788_v7, %s3974_s21 }
 0x7cb   :  { %v791_v11 = vpop.permute.xlu1 %790 }
 0x7cc   :  { %v793_v12 = vadd.f32 %v791_v11, %v783_v10  ;;  %v42_v10 = vld [vmem:[%s4640_s0 + $0x30] sm:$0xff] }
 0x7cd   :  { %3083 = vmatmul.mubr.msk.f32.gmra.mrb[12].mxu1 %vm62_vm0, %v42_v10 }
 0x7ce   :  { %3823 = vtanh.f32 %v793_v12  ;;  %214 = vmatprep.mubr.f32.mxu1 %v3973_v2 }
 0x7cf   :  { %3825 = vpow2.f32 %v3104_v15 }
 0x7d8   :  { %v3824_v14 = vpop.eup %3823 }
 0x7d9   :  { %796 = vrot.lane.b32.xlu0 %v3824_v14, %s3974_s21  ;;  %v3826_v19 = vpop.eup %3825 }
 0x7da   :  { %v777_v21 = vadd.f32 1.0, %v3826_v19 }
 0x7dc   :  { %3827 = vrcp.f32 %v777_v21 }
 0x7e6   :  { %v3828_v22 = vpop.eup %3827 }
 0x84b   :  { %v797_v24 = vpop.permute.xlu0 %796 }
 0x84c   :  { %v4161_v25 = vmul.f32 %v3828_v22, %v797_v24 }
 0x84e   :  { %3106 = vmatmul.mubr.msk.f32.vlgmr.msra.gmra.mrb[6].mxu0 %vm322_vm2, %v4161_v25 }
 0x84f   :  { %3485 = vmatpush1.bf16.msra.mxu0 %v4026_v17  ;;  %1127 = vmatprep.mubr.f32.mxu0 %v3973_v2 }
 0x850   :  { %3487 = vmatprep.subr.bf16.mxu0 %v4036_v20 }
 0x853   :  { %3489 = vmatpush1.bf16.msra.mxu0 %v4044_v23 }
 0x854   :  { %3491 = vmatprep.subr.bf16.mxu0 %v4054_v26 }
 0x857   :  { %3493 = vmatpush1.bf16.msra.mxu0 %v4062_v29 }
 0x858   :  { %3495 = vmatprep.subr.bf16.mxu0 %v4072_v32 }
 0x85b   :  { %3497 = vmatpush1.bf16.msra.mxu0 %v4080_v36 }
 0x85c   :  { %3505 = vmatprep.subr.bf16.mxu0 %v4017_v13 }
 0x8a0   :  { %v210_v18 = vpop.f32.mrb[12].mxu1 }
 0x8a1   :  { %v212_v19 = vpop.f32.mrb[13].mxu1 }
 0x921   :  { %v946_v31 = vpop.f32.mrb[6].mxu0 }
 0x922   :  { %v951_v33 = vadd.f32 %v946_v31, %v199_v28  ;;  %v948_v34 = vpop.f32.mrb[7].mxu0  ;;  %v211_v31 = vadd.f32 %v210_v18, %v4091_v39 }
 0x923   :  { %v952_v35 = vadd.f32 %v948_v34, %v201_v30 }
 0x924   :  { %v3107_v38 = vmul.f32 -1.442695, %v951_v33  ;;  %v213_v33 = vadd.f32 %v212_v19, %v4009_v8 }
 0x925   :  { %3829 = vtanh.f32 %v952_v35  ;;  %v3108_v50 = vmul.f32 -1.442695, %v952_v35 }
 0x926   :  { %3831 = vpow2.f32 %v3107_v38 }
 0x92f   :  { %v3830_v37 = vpop.eup %3829 }
 0x930   :  { %968 = vrot.lane.b32.xlu1 %v3830_v37, %s3974_s21  ;;  %v3832_v40 = vpop.eup %3831 }
 0x931   :  { %v959_v41 = vadd.f32 1.0, %v3832_v40 }
 0x933   :  { %3833 = vrcp.f32 %v959_v41 }
 0x93d   :  { %v3834_v42 = vpop.eup %3833 }
 0x93e   :  { %v966_v46 = vmul.f32 %v3834_v42, %v793_v12 }
 0x9a2   :  { %v969_v43 = vpop.permute.xlu1 %968 }
 0x9a3   :  { %v971_v44 = vmul.f32 %v3834_v42, %v969_v43 }
 0x9a5   :  { %973 = vrot.lane.b32.xlu0 %v971_v44, %s3974_s21 }
 0xa17   :  { %v974_v47 = vpop.permute.xlu0 %973 }
 0xa18   :  { %v976_v48 = vadd.f32 %v974_v47, %v966_v46  ;;  %v43_v47 = vld [vmem:[%s4640_s0 + $0x38] sm:$0xff] }
 0xa19   :  { %3084 = vmatmul.mubr.msk.f32.gmra.mrb[14].mxu1 %vm62_vm0, %v43_v47 }
 0xa1a   :  { %3835 = vtanh.f32 %v976_v48  ;;  %220 = vmatprep.mubr.f32.mxu1 %v3973_v2 }
 0xa1b   :  { %3837 = vpow2.f32 %v3108_v50 }
 0xa24   :  { %v3836_v49 = vpop.eup %3835 }
 0xa25   :  { %979 = vrot.lane.b32.xlu1 %v3836_v49, %s3974_s21  ;;  %v3838_v53 = vpop.eup %3837 }
 0xa26   :  { %v960_v54 = vadd.f32 1.0, %v3838_v53 }
 0xa28   :  { %3839 = vrcp.f32 %v960_v54 }
 0xa32   :  { %v3840_v55 = vpop.eup %3839 }
 0xa97   :  { %v980_v56 = vpop.permute.xlu1 %979 }
 0xa98   :  { %v4184_v58 = vmul.f32 %v3840_v55, %v980_v56 }
 0xa9a   :  { %3110 = vmatmul.mubr.msk.f32.vlgmr.msra.gmra.mrb[8].mxu0 %vm322_vm2, %v4184_v58 }
 0xa9b   :  { %3507 = vmatpush1.bf16.msra.mxu0 %v4026_v17  ;;  %1310 = vmatprep.mubr.f32.mxu0 %v3973_v2 }
 0xa9c   :  { %3509 = vmatprep.subr.bf16.mxu0 %v4036_v20 }
 0xa9f   :  { %3511 = vmatpush1.bf16.msra.mxu0 %v4044_v23 }
 0xaa0   :  { %3513 = vmatprep.subr.bf16.mxu0 %v4054_v26 }
 0xaa3   :  { %3515 = vmatpush1.bf16.msra.mxu0 %v4062_v29 }
 0xaa4   :  { %3517 = vmatprep.subr.bf16.mxu0 %v4072_v32 }
 0xaa7   :  { %3519 = vmatpush1.bf16.msra.mxu0 %v4080_v36 }
 0xaa8   :  { %3527 = vmatprep.subr.bf16.mxu0 %v4017_v13 }
 0xaec   :  { %v216_v53 = vpop.f32.mrb[14].mxu1 }
 0xaed   :  { %v218_v54 = vpop.f32.mrb[15].mxu1 }
 0xb6d   :  { %v1129_v61 = vpop.f32.mrb[8].mxu0 }
 0xb6e   :  { %v1134_v62 = vadd.f32 %v1129_v61, %v205_v59  ;;  %v1131_v63 = vpop.f32.mrb[9].mxu0 }
 0xb6f   :  { %v1135_v0 = vadd.f32 %v1131_v63, %v207_v60  ;;  %v219_v63 = vadd.f32 %v218_v54, %v4009_v8 }
 0xb70   :  { %v3111_v3 = vmul.f32 -1.442695, %v1134_v62  ;;  %v217_v62 = vadd.f32 %v216_v53, %v4091_v39 }
 0xb71   :  { %3841 = vtanh.f32 %v1135_v0  ;;  %v3112_v16 = vmul.f32 -1.442695, %v1135_v0 }
 0xb72   :  { %3843 = vpow2.f32 %v3111_v3 }
 0xb7b   :  { %v3842_v1 = vpop.eup %3841 }
 0xb7c   :  { %1151 = vrot.lane.b32.xlu0 %v3842_v1, %s3974_s21  ;;  %v3844_v4 = vpop.eup %3843 }
 0xb7d   :  { %v1142_v5 = vadd.f32 1.0, %v3844_v4 }
 0xb7f   :  { %3845 = vrcp.f32 %v1142_v5 }
 0xb89   :  { %v3846_v6 = vpop.eup %3845 }
 0xb8a   :  { %v1149_v11 = vmul.f32 %v3846_v6, %v976_v48 }
 0xbee   :  { %v1152_v7 = vpop.permute.xlu0 %1151 }
 0xbef   :  { %v1154_v9 = vmul.f32 %v3846_v6, %v1152_v7 }
 0xbf1   :  { %1156 = vrot.lane.b32.xlu1 %v1154_v9, %s3974_s21 }
 0xc63   :  { %v1157_v12 = vpop.permute.xlu1 %1156 }
 0xc64   :  { %v1159_v14 = vadd.f32 %v1157_v12, %v1149_v11 }
 0xc66   :  { %3847 = vtanh.f32 %v1159_v14 }
 0xc67   :  { %3849 = vpow2.f32 %v3112_v16 }
 0xc70   :  { %v3848_v15 = vpop.eup %3847 }
 0xc71   :  { %1162 = vrot.lane.b32.xlu0 %v3848_v15, %s3974_s21  ;;  %v3850_v21 = vpop.eup %3849 }
 0xc72   :  { %v1143_v22 = vadd.f32 1.0, %v3850_v21 }
 0xc74   :  { %3851 = vrcp.f32 %v1143_v22 }
 0xc7e   :  { %v3852_v24 = vpop.eup %3851 }
 0xce3   :  { %v1163_v28 = vpop.permute.xlu0 %1162 }
 0xce4   :  { %v4207_v30 = vmul.f32 %v3852_v24, %v1163_v28 }
 0xce6   :  { %3114 = vmatmul.mubr.msk.f32.vlgmr.msra.gmra.mrb[10].mxu0 %vm322_vm2, %v4207_v30 }
 0xce7   :  { %3529 = vmatpush1.bf16.msra.mxu0 %v4026_v17  ;;  %1493 = vmatprep.mubr.f32.mxu0 %v3973_v2 }
 0xce8   :  { %3531 = vmatprep.subr.bf16.mxu0 %v4036_v20 }
 0xceb   :  { %3533 = vmatpush1.bf16.msra.mxu0 %v4044_v23 }
 0xcec   :  { %3535 = vmatprep.subr.bf16.mxu0 %v4054_v26 }
 0xcef   :  { %3537 = vmatpush1.bf16.msra.mxu0 %v4062_v29 }
 0xcf0   :  { %3539 = vmatprep.subr.bf16.mxu0 %v4072_v32 }
 0xcf3   :  { %3541 = vmatpush1.bf16.msra.mxu0 %v4080_v36 }
 0xcf4   :  { %3549 = vmatprep.subr.bf16.mxu0 %v4017_v13 }
 0xdb9   :  { %v1312_v34 = vpop.f32.mrb[10].mxu0 }
 0xdba   :  { %v1317_v35 = vadd.f32 %v1312_v34, %v211_v31  ;;  %v1314_v37 = vpop.f32.mrb[11].mxu0 }
 0xdbb   :  { %v1318_v38 = vadd.f32 %v1314_v37, %v213_v33 }
 0xdbc   :  { %v3115_v41 = vmul.f32 -1.442695, %v1317_v35 }
 0xdbd   :  { %3853 = vtanh.f32 %v1318_v38  ;;  %v3116_v52 = vmul.f32 -1.442695, %v1318_v38 }
 0xdbe   :  { %3855 = vpow2.f32 %v3115_v41 }
 0xdc7   :  { %v3854_v40 = vpop.eup %3853 }
 0xdc8   :  { %1334 = vrot.lane.b32.xlu1 %v3854_v40, %s3974_s21  ;;  %v3856_v42 = vpop.eup %3855 }
 0xdc9   :  { %v1325_v43 = vadd.f32 1.0, %v3856_v42 }
 0xdcb   :  { %3857 = vrcp.f32 %v1325_v43 }
 0xdd5   :  { %v3858_v44 = vpop.eup %3857 }
 0xdd6   :  { %v1332_v48 = vmul.f32 %v3858_v44, %v1159_v14  ;;  %v44_v14 = vld [vmem:[%s4640_s0 + $0x40] sm:$0xff] }
 0xdd7   :  { %3085 = vmatmul.mubr.msk.f32.gmra.mrb[16].mxu1 %vm62_vm0, %v44_v14 }
 0xdd8   :  { %226 = vmatprep.mubr.f32.mxu1 %v3973_v2 }
 0xe3a   :  { %v1335_v45 = vpop.permute.xlu1 %1334 }
 0xe3b   :  { %v1337_v46 = vmul.f32 %v3858_v44, %v1335_v45 }
 0xe3d   :  { %1339 = vrot.lane.b32.xlu0 %v1337_v46, %s3974_s21 }
 0xeaa   :  { %v222_v22 = vpop.f32.mrb[16].mxu1 }
 0xeab   :  { %v224_v24 = vpop.f32.mrb[17].mxu1  ;;  %v223_v37 = vadd.f32 %v222_v22, %v4091_v39 }
 0xeac   :  { %v225_v38 = vadd.f32 %v224_v24, %v4009_v8 }
 0xeaf   :  { %v1340_v49 = vpop.permute.xlu0 %1339 }
 0xeb0   :  { %v1342_v50 = vadd.f32 %v1340_v49, %v1332_v48 }
 0xeb2   :  { %3859 = vtanh.f32 %v1342_v50 }
 0xeb3   :  { %3861 = vpow2.f32 %v3116_v52 }
 0xebc   :  { %v3860_v51 = vpop.eup %3859 }
 0xebd   :  { %1345 = vrot.lane.b32.xlu1 %v3860_v51, %s3974_s21  ;;  %v3862_v55 = vpop.eup %3861  ;;  %v45_v51 = vld [vmem:[%s4640_s0 + $0x48] sm:$0xff] }
 0xebe   :  { %v1326_v56 = vadd.f32 1.0, %v3862_v55  ;;  %3086 = vmatmul.mubr.msk.f32.gmra.mrb[18].mxu1 %vm62_vm0, %v45_v51 }
 0xebf   :  { %232 = vmatprep.mubr.f32.mxu1 %v3973_v2 }
 0xec0   :  { %3863 = vrcp.f32 %v1326_v56 }
 0xeca   :  { %v3864_v59 = vpop.eup %3863 }
 0xf2f   :  { %v1346_v60 = vpop.permute.xlu1 %1345 }
 0xf30   :  { %v4230_v61 = vmul.f32 %v3864_v59, %v1346_v60 }
 0xf32   :  { %3118 = vmatmul.mubr.msk.f32.vlgmr.msra.gmra.mrb[12].mxu0 %vm322_vm2, %v4230_v61 }
 0xf33   :  { %3551 = vmatpush1.bf16.msra.mxu0 %v4026_v17  ;;  %1676 = vmatprep.mubr.f32.mxu0 %v3973_v2 }
 0xf34   :  { %3553 = vmatprep.subr.bf16.mxu0 %v4036_v20 }
 0xf37   :  { %3555 = vmatpush1.bf16.msra.mxu0 %v4044_v23 }
 0xf38   :  { %3557 = vmatprep.subr.bf16.mxu0 %v4054_v26 }
 0xf3b   :  { %3559 = vmatpush1.bf16.msra.mxu0 %v4062_v29 }
 0xf3c   :  { %3561 = vmatprep.subr.bf16.mxu0 %v4072_v32 }
 0xf3f   :  { %3563 = vmatpush1.bf16.msra.mxu0 %v4080_v36 }
 0xf40   :  { %3571 = vmatprep.subr.bf16.mxu0 %v4017_v13 }
 0xf91   :  { %v228_v59 = vpop.f32.mrb[18].mxu1 }
 0xf92   :  { %v230_v60 = vpop.f32.mrb[19].mxu1 }
0x1005   :  { %v1495_v0 = vpop.f32.mrb[12].mxu0 }
0x1006   :  { %v1500_v1 = vadd.f32 %v1495_v0, %v217_v62  ;;  %v1497_v3 = vpop.f32.mrb[13].mxu0 }
0x1007   :  { %v1501_v4 = vadd.f32 %v1497_v3, %v219_v63 }
0x1008   :  { %v3119_v6 = vmul.f32 -1.442695, %v1500_v1 }
0x1009   :  { %3865 = vtanh.f32 %v1501_v4  ;;  %v3120_v21 = vmul.f32 -1.442695, %v1501_v4  ;;  %v229_v4 = vadd.f32 %v228_v59, %v4091_v39  ;;  %v47_v59 = vld [vmem:[%s4640_s0 + $0x58] sm:$0xff] }
0x100a   :  { %3867 = vpow2.f32 %v3119_v6 }
0x1013   :  { %v3866_v5 = vpop.eup %3865 }
0x1014   :  { %1517 = vrot.lane.b32.xlu0 %v3866_v5, %s3974_s21  ;;  %v3868_v7 = vpop.eup %3867  ;;  %v231_v5 = vadd.f32 %v230_v60, %v4009_v8 }
0x1015   :  { %v1508_v9 = vadd.f32 1.0, %v3868_v7 }
0x1017   :  { %3869 = vrcp.f32 %v1508_v9 }
0x1021   :  { %v3870_v10 = vpop.eup %3869 }
0x1022   :  { %v1515_v15 = vmul.f32 %v3870_v10, %v1342_v50 }
0x1086   :  { %v1518_v11 = vpop.permute.xlu0 %1517 }
0x1087   :  { %v1520_v12 = vmul.f32 %v3870_v10, %v1518_v11 }
0x1089   :  { %1522 = vrot.lane.b32.xlu1 %v1520_v12, %s3974_s21 }
0x10fb   :  { %v1523_v16 = vpop.permute.xlu1 %1522 }
0x10fc   :  { %v1525_v18 = vadd.f32 %v1523_v16, %v1515_v15 }
0x10fe   :  { %3871 = vtanh.f32 %v1525_v18 }
0x10ff   :  { %3873 = vpow2.f32 %v3120_v21  ;;  %v46_v21 = vld [vmem:[%s4640_s0 + $0x50] sm:$0xff] }
0x1100   :  { %3087 = vmatmul.mubr.msk.f32.gmra.mrb[20].mxu1 %vm62_vm0, %v46_v21 }
0x1101   :  { %238 = vmatprep.mubr.f32.mxu1 %v3973_v2 }
0x1104   :  { %3088 = vmatmul.mubr.msk.f32.gmra.mrb[22].mxu1 %vm62_vm0, %v47_v59 }
0x1105   :  { %244 = vmatprep.mubr.f32.mxu1 %v3973_v2 }
0x1108   :  { %v3872_v19 = vpop.eup %3871 }
0x1109   :  { %1528 = vrot.lane.b32.xlu0 %v3872_v19, %s3974_s21  ;;  %v3874_v28 = vpop.eup %3873 }
0x110a   :  { %v1509_v31 = vadd.f32 1.0, %v3874_v28 }
0x110c   :  { %3875 = vrcp.f32 %v1509_v31 }
0x1116   :  { %v3876_v33 = vpop.eup %3875 }
0x117b   :  { %v1529_v34 = vpop.permute.xlu0 %1528 }
0x117c   :  { %v4253_v35 = vmul.f32 %v3876_v33, %v1529_v34 }
0x117e   :  { %3122 = vmatmul.mubr.msk.f32.vlgmr.msra.gmra.mrb[14].mxu0 %vm322_vm2, %v4253_v35 }
0x117f   :  { %3573 = vmatpush1.bf16.msra.mxu0 %v4026_v17  ;;  %1859 = vmatprep.mubr.f32.mxu0 %v3973_v2 }
0x1180   :  { %3575 = vmatprep.subr.bf16.mxu0 %v4036_v20 }
0x1183   :  { %3577 = vmatpush1.bf16.msra.mxu0 %v4044_v23 }
0x1184   :  { %3579 = vmatprep.subr.bf16.mxu0 %v4054_v26 }
0x1187   :  { %3581 = vmatpush1.bf16.msra.mxu0 %v4062_v29 }
0x1188   :  { %3583 = vmatprep.subr.bf16.mxu0 %v4072_v32 }
0x118b   :  { %3585 = vmatpush1.bf16.msra.mxu0 %v4080_v36 }
0x118c   :  { %3593 = vmatprep.subr.bf16.mxu0 %v4017_v13 }
0x11d3   :  { %v234_v34 = vpop.f32.mrb[20].mxu1 }
0x1251   :  { %v1678_v40 = vpop.f32.mrb[14].mxu0 }
0x1252   :  { %v1683_v41 = vadd.f32 %v1678_v40, %v223_v37  ;;  %v1680_v42 = vpop.f32.mrb[15].mxu0  ;;  %v236_v37 = vpop.f32.mrb[21].mxu1 }
0x1253   :  { %v1684_v43 = vadd.f32 %v1680_v42, %v225_v38 }
0x1254   :  { %v3123_v45 = vmul.f32 -1.442695, %v1683_v41 }
0x1255   :  { %3877 = vtanh.f32 %v1684_v43  ;;  %v3124_v56 = vmul.f32 -1.442695, %v1684_v43 }
0x1256   :  { %3879 = vpow2.f32 %v3123_v45  ;;  %v237_v45 = vadd.f32 %v236_v37, %v4009_v8  ;;  %v48_v37 = vld [vmem:[%s4640_s0 + $0x60] sm:$0xff] }
0x1257   :  { %3089 = vmatmul.mubr.msk.f32.gmra.mrb[24].mxu1 %vm62_vm0, %v48_v37 }
0x1258   :  { %250 = vmatprep.mubr.f32.mxu1 %v3973_v2 }
0x125f   :  { %v3878_v44 = vpop.eup %3877 }
0x1260   :  { %1700 = vrot.lane.b32.xlu1 %v3878_v44, %s3974_s21  ;;  %v3880_v46 = vpop.eup %3879  ;;  %v235_v44 = vadd.f32 %v234_v34, %v4091_v39 }
0x1261   :  { %v1691_v47 = vadd.f32 1.0, %v3880_v46 }
0x1263   :  { %3881 = vrcp.f32 %v1691_v47 }
0x126d   :  { %v3882_v48 = vpop.eup %3881 }
0x126e   :  { %v1698_v52 = vmul.f32 %v3882_v48, %v1525_v18 }
0x12d2   :  { %v1701_v49 = vpop.permute.xlu1 %1700 }
0x12d3   :  { %v1703_v50 = vmul.f32 %v3882_v48, %v1701_v49 }
0x12d5   :  { %1705 = vrot.lane.b32.xlu0 %v1703_v50, %s3974_s21 }
0x1347   :  { %v1706_v53 = vpop.permute.xlu0 %1705 }
0x1348   :  { %v1708_v54 = vadd.f32 %v1706_v53, %v1698_v52 }
0x134a   :  { %3883 = vtanh.f32 %v1708_v54 }
0x134b   :  { %3885 = vpow2.f32 %v3124_v56 }
0x1354   :  { %v3884_v55 = vpop.eup %3883 }
0x1355   :  { %1711 = vrot.lane.b32.xlu1 %v3884_v55, %s3974_s21  ;;  %v3886_v62 = vpop.eup %3885 }
0x1356   :  { %v1692_v63 = vadd.f32 1.0, %v3886_v62 }
0x1358   :  { %3887 = vrcp.f32 %v1692_v63 }
0x1362   :  { %v3888_v0 = vpop.eup %3887 }
0x13c7   :  { %v1712_v1 = vpop.permute.xlu1 %1711 }
0x13c8   :  { %v4276_v3 = vmul.f32 %v3888_v0, %v1712_v1 }
0x13ca   :  { %3126 = vmatmul.mubr.msk.f32.vlgmr.msra.gmra.mrb[16].mxu0 %vm322_vm2, %v4276_v3 }
0x13cb   :  { %3595 = vmatpush1.bf16.msra.mxu0 %v4026_v17  ;;  %2042 = vmatprep.mubr.f32.mxu0 %v3973_v2 }
0x13cc   :  { %3597 = vmatprep.subr.bf16.mxu0 %v4036_v20 }
0x13cf   :  { %3599 = vmatpush1.bf16.msra.mxu0 %v4044_v23 }
0x13d0   :  { %3601 = vmatprep.subr.bf16.mxu0 %v4054_v26 }
0x13d3   :  { %3603 = vmatpush1.bf16.msra.mxu0 %v4062_v29 }
0x13d4   :  { %3605 = vmatprep.subr.bf16.mxu0 %v4072_v32 }
0x13d7   :  { %3607 = vmatpush1.bf16.msra.mxu0 %v4080_v36 }
0x13d8   :  { %3615 = vmatprep.subr.bf16.mxu0 %v4017_v13 }
0x149d   :  { %v1861_v6 = vpop.f32.mrb[16].mxu0 }
0x149e   :  { %v1866_v7 = vadd.f32 %v1861_v6, %v229_v4  ;;  %v1863_v9 = vpop.f32.mrb[17].mxu0  ;;  %v240_v4 = vpop.f32.mrb[22].mxu1 }
0x149f   :  { %v1867_v10 = vadd.f32 %v1863_v9, %v231_v5  ;;  %v242_v5 = vpop.f32.mrb[23].mxu1 }
0x14a0   :  { %v3127_v12 = vmul.f32 -1.442695, %v1866_v7 }
0x14a1   :  { %3889 = vtanh.f32 %v1867_v10  ;;  %v3128_v33 = vmul.f32 -1.442695, %v1867_v10 }
0x14a2   :  { %3891 = vpow2.f32 %v3127_v12  ;;  %v241_v12 = vadd.f32 %v240_v4, %v4091_v39 }
0x14ab   :  { %v3890_v11 = vpop.eup %3889 }
0x14ac   :  { %1883 = vrot.lane.b32.xlu0 %v3890_v11, %s3974_s21  ;;  %v3892_v14 = vpop.eup %3891 }
0x14ad   :  { %v1874_v15 = vadd.f32 1.0, %v3892_v14  ;;  %v243_v14 = vadd.f32 %v242_v5, %v4009_v8 }
0x14af   :  { %3893 = vrcp.f32 %v1874_v15 }
0x14b9   :  { %v3894_v16 = vpop.eup %3893 }
0x14ba   :  { %v1881_v22 = vmul.f32 %v3894_v16, %v1708_v54 }
0x151e   :  { %v1884_v18 = vpop.permute.xlu0 %1883 }
0x151f   :  { %v1886_v19 = vmul.f32 %v3894_v16, %v1884_v18 }
0x1521   :  { %1888 = vrot.lane.b32.xlu1 %v1886_v19, %s3974_s21 }
0x1593   :  { %v1889_v24 = vpop.permute.xlu1 %1888 }
0x1594   :  { %v1891_v28 = vadd.f32 %v1889_v24, %v1881_v22 }
0x1596   :  { %3895 = vtanh.f32 %v1891_v28 }
0x1597   :  { %3897 = vpow2.f32 %v3128_v33 }
0x15a0   :  { %v3896_v31 = vpop.eup %3895 }
0x15a1   :  { %1894 = vrot.lane.b32.xlu0 %v3896_v31, %s3974_s21  ;;  %v3898_v38 = vpop.eup %3897 }
0x15a2   :  { %v1875_v40 = vadd.f32 1.0, %v3898_v38 }
0x15a4   :  { %3899 = vrcp.f32 %v1875_v40 }
0x15ae   :  { %v3900_v41 = vpop.eup %3899 }
0x1613   :  { %v1895_v42 = vpop.permute.xlu0 %1894 }
0x1614   :  { %v4299_v43 = vmul.f32 %v3900_v41, %v1895_v42 }
0x1616   :  { %3130 = vmatmul.mubr.msk.f32.vlgmr.msra.gmra.mrb[18].mxu0 %vm322_vm2, %v4299_v43 }
0x1617   :  { %3617 = vmatpush1.bf16.msra.mxu0 %v4026_v17  ;;  %2225 = vmatprep.mubr.f32.mxu0 %v3973_v2 }
0x1618   :  { %3619 = vmatprep.subr.bf16.mxu0 %v4036_v20 }
0x161b   :  { %3621 = vmatpush1.bf16.msra.mxu0 %v4044_v23 }
0x161c   :  { %3623 = vmatprep.subr.bf16.mxu0 %v4054_v26 }
0x161f   :  { %3625 = vmatpush1.bf16.msra.mxu0 %v4062_v29 }
0x1620   :  { %3627 = vmatprep.subr.bf16.mxu0 %v4072_v32 }
0x1623   :  { %3629 = vmatpush1.bf16.msra.mxu0 %v4080_v36 }
0x1624   :  { %3637 = vmatprep.subr.bf16.mxu0 %v4017_v13 }
0x16e9   :  { %v2044_v46 = vpop.f32.mrb[18].mxu0 }
0x16ea   :  { %v2049_v47 = vadd.f32 %v2044_v46, %v235_v44  ;;  %v2046_v48 = vpop.f32.mrb[19].mxu0 }
0x16eb   :  { %v2050_v49 = vadd.f32 %v2046_v48, %v237_v45  ;;  %v246_v45 = vpop.f32.mrb[24].mxu1 }
0x16ec   :  { %v3131_v51 = vmul.f32 -1.442695, %v2049_v47  ;;  %v248_v46 = vpop.f32.mrb[25].mxu1 }
0x16ed   :  { %3901 = vtanh.f32 %v2050_v49  ;;  %v3132_v1 = vmul.f32 -1.442695, %v2050_v49 }
0x16ee   :  { %3903 = vpow2.f32 %v3131_v51 }
0x16f7   :  { %v3902_v50 = vpop.eup %3901 }
0x16f8   :  { %2066 = vrot.lane.b32.xlu1 %v3902_v50, %s3974_s21  ;;  %v3904_v52 = vpop.eup %3903 }
0x16f9   :  { %v2057_v53 = vadd.f32 1.0, %v3904_v52  ;;  %v247_v52 = vadd.f32 %v246_v45, %v4091_v39 }
0x16fb   :  { %3905 = vrcp.f32 %v2057_v53  ;;  %v249_v53 = vadd.f32 %v248_v46, %v4009_v8  ;;  %v50_v46 = vld [vmem:[%s4640_s0 + $0x70] sm:$0xff] }
0x1705   :  { %v3906_v54 = vpop.eup %3905 }
0x1706   :  { %v2064_v60 = vmul.f32 %v3906_v54, %v1891_v28 }
0x176a   :  { %v2067_v55 = vpop.permute.xlu1 %2066 }
0x176b   :  { %v2069_v56 = vmul.f32 %v3906_v54, %v2067_v55 }
0x176d   :  { %2071 = vrot.lane.b32.xlu0 %v2069_v56, %s3974_s21 }
0x17df   :  { %v2072_v62 = vpop.permute.xlu0 %2071 }
0x17e0   :  { %v2074_v63 = vadd.f32 %v2072_v62, %v2064_v60 }
0x17e2   :  { %3907 = vtanh.f32 %v2074_v63 }
0x17e3   :  { %3909 = vpow2.f32 %v3132_v1 }
0x17ec   :  { %v3908_v0 = vpop.eup %3907 }
0x17ed   :  { %2077 = vrot.lane.b32.xlu1 %v3908_v0, %s3974_s21  ;;  %v3910_v6 = vpop.eup %3909 }
0x17ee   :  { %v2058_v7 = vadd.f32 1.0, %v3910_v6  ;;  %v49_v6 = vld [vmem:[%s4640_s0 + $0x68] sm:$0xff]  ;;  %s3977_s0 = smov 96  }
0x17ef   :  { %3090 = vmatmul.mubr.msk.f32.gmra.mrb[26].mxu1 %vm62_vm0, %v49_v6 }
0x17f0   :  { %3911 = vrcp.f32 %v2058_v7  ;;  %256 = vmatprep.mubr.f32.mxu1 %v3973_v2 }
0x17f3   :  { %3091 = vmatmul.mubr.msk.f32.gmra.mrb[28].mxu1 %vm62_vm0, %v50_v46 }
0x17f4   :  { %3237 = vmatprep.mubr.msk.f32.mxu1 %vm3976_vm3, %v3973_v2 }
0x17fa   :  { %v3912_v9 = vpop.eup %3911 }
0x185f   :  { %v2078_v10 = vpop.permute.xlu1 %2077 }
0x1860   :  { %v4322_v11 = vmul.f32 %v3912_v9, %v2078_v10 }
0x1862   :  { %3134 = vmatmul.mubr.msk.f32.vlgmr.msra.gmra.mrb[20].mxu0 %vm322_vm2, %v4322_v11 }
0x1863   :  { %3639 = vmatpush1.bf16.msra.mxu0 %v4026_v17  ;;  %2408 = vmatprep.mubr.f32.mxu0 %v3973_v2 }
0x1864   :  { %3641 = vmatprep.subr.bf16.mxu0 %v4036_v20 }
0x1867   :  { %3643 = vmatpush1.bf16.msra.mxu0 %v4044_v23 }
0x1868   :  { %3645 = vmatprep.subr.bf16.mxu0 %v4054_v26 }
0x186b   :  { %3647 = vmatpush1.bf16.msra.mxu0 %v4062_v29 }
0x186c   :  { %3649 = vmatprep.subr.bf16.mxu0 %v4072_v32 }
0x186f   :  { %3651 = vmatpush1.bf16.msra.mxu0 %v4080_v36 }
0x1870   :  { %3659 = vmatprep.subr.bf16.mxu0 %v4017_v13 }
0x1935   :  { %v2227_v15 = vpop.f32.mrb[20].mxu0 }
0x1936   :  { %v2232_v16 = vadd.f32 %v2227_v15, %v241_v12  ;;  %v2229_v18 = vpop.f32.mrb[21].mxu0  ;;  %v252_v15 = vpop.f32.mrb[26].mxu1 }
0x1937   :  { %v2233_v19 = vadd.f32 %v2229_v18, %v243_v14  ;;  %v253_v37 = vadd.f32 %v252_v15, %v4091_v39 }
0x1938   :  { %v3135_v22 = vmul.f32 -1.442695, %v2232_v16  ;;  %v254_v16 = vpop.f32.mrb[27].mxu1 }
0x1939   :  { %3913 = vtanh.f32 %v2233_v19  ;;  %v3136_v44 = vmul.f32 -1.442695, %v2233_v19 }
0x193a   :  { %3915 = vpow2.f32 %v3135_v22 }
0x1943   :  { %v3914_v21 = vpop.eup %3913 }
0x1944   :  { %2249 = vrot.lane.b32.xlu0 %v3914_v21, %s3974_s21  ;;  %v3916_v24 = vpop.eup %3915 }
0x1945   :  { %v2240_v28 = vadd.f32 1.0, %v3916_v24 }
0x1947   :  { %3917 = vrcp.f32 %v2240_v28  ;;  %v31_v28 = vld [vmem:[%s4639_s1 + $0xa0] sm:$0xff] }
0x1951   :  { %v3918_v31 = vpop.eup %3917 }
0x1952   :  { %v2247_v38 = vmul.f32 %v3918_v31, %v2074_v63 }
0x19b6   :  { %v2250_v33 = vpop.permute.xlu0 %2249 }
0x19b7   :  { %v2252_v34 = vmul.f32 %v3918_v31, %v2250_v33  ;;  %v32_v31 = vld [vmem:[%s4639_s1 + $0xb0] sm:$0xff]  ;;  %v3975_v33 = vmov 0.0|0.0  }
0x19b8   :  { %3410 = vmatprep.subr.bf16.mxu1 %v3975_v33 }
0x19b9   :  { %2254 = vrot.lane.b32.xlu1 %v2252_v34, %s3974_s21  ;;  %v4378_v34 = vpack.c.bf16 %v32_v31, %v31_v28 }
0x19bb   :  { %3412 = vmatpush3.bf16.msra.mxu1 %v4378_v34 }
0x19bc   :  { %3413 = vmatprep.subr.bf16.mxu1 %v3975_v33 }
0x1a2b   :  { %v2255_v40 = vpop.permute.xlu1 %2254 }
0x1a2c   :  { %v2257_v41 = vadd.f32 %v2255_v40, %v2247_v38  ;;  %v255_v38 = vadd.f32 %v254_v16, %v4009_v8 }
0x1a2e   :  { %3919 = vtanh.f32 %v2257_v41 }
0x1a2f   :  { %3921 = vpow2.f32 %v3136_v44 }
0x1a38   :  { %v3920_v42 = vpop.eup %3919 }
0x1a39   :  { %2260 = vrot.lane.b32.xlu0 %v3920_v42, %s3974_s21  ;;  %v3922_v47 = vpop.eup %3921  ;;  %v34_v42 = vld [vmem:[%s4639_s1 + $0xd0] sm:$0xff] }
0x1a3a   :  { %v2241_v48 = vadd.f32 1.0, %v3922_v47 }
0x1a3c   :  { %3923 = vrcp.f32 %v2241_v48 }
0x1a46   :  { %v3924_v49 = vpop.eup %3923 }
0x1aab   :  { %v2261_v50 = vpop.permute.xlu0 %2260 }
0x1aac   :  { %v4345_v51 = vmul.f32 %v3924_v49, %v2261_v50 }
0x1aae   :  { %3138 = vmatmul.mubr.msk.f32.vlgmr.msra.gmra.mrb[22].mxu0 %vm322_vm2, %v4345_v51 }
0x1aaf   :  { %3661 = vmatpush1.bf16.msra.mxu0 %v4026_v17  ;;  %2591 = vmatprep.mubr.f32.mxu0 %v3973_v2 }
0x1ab0   :  { %3663 = vmatprep.subr.bf16.mxu0 %v4036_v20 }
0x1ab3   :  { %3665 = vmatpush1.bf16.msra.mxu0 %v4044_v23 }
0x1ab4   :  { %3667 = vmatprep.subr.bf16.mxu0 %v4054_v26 }
0x1ab7   :  { %3669 = vmatpush1.bf16.msra.mxu0 %v4062_v29 }
0x1ab8   :  { %3671 = vmatprep.subr.bf16.mxu0 %v4072_v32 }
0x1abb   :  { %3673 = vmatpush1.bf16.msra.mxu0 %v4080_v36 }
0x1b81   :  { %v2410_v54 = vpop.f32.mrb[22].mxu0 }
0x1b82   :  { %v2415_v55 = vadd.f32 %v2410_v54, %v247_v52  ;;  %v2412_v56 = vpop.f32.mrb[23].mxu0 }
0x1b83   :  { %v2416_v59 = vadd.f32 %v2412_v56, %v249_v53 }
0x1b84   :  { %v3139_v62 = vmul.f32 -1.442695, %v2415_v55 }
0x1b85   :  { %3925 = vtanh.f32 %v2416_v59  ;;  %v3140_v14 = vmul.f32 -1.442695, %v2416_v59 }
0x1b86   :  { %3927 = vpow2.f32 %v3139_v62  ;;  %v4483_v62 = vld [vmem:[%s4639_s1 + $0xe0] ss:$0 sm:$0xff] }
0x1b8f   :  { %v3926_v60 = vpop.eup %3925 }
0x1b90   :  { %2432 = vrot.lane.b32.xlu1 %v3926_v60, %s3974_s21  ;;  %v3928_v63 = vpop.eup %3927 }
0x1b91   :  { %v2423_v0 = vadd.f32 1.0, %v3928_v63 }
0x1b93   :  { %3929 = vrcp.f32 %v2423_v0 }
0x1b9d   :  { %v3930_v1 = vpop.eup %3929 }
0x1b9e   :  { %v2430_v7 = vmul.f32 %v3930_v1, %v2257_v41  ;;  %v33_v41 = vld [vmem:[%s4639_s1 + $0xc0] sm:$0xff] }
0x1b9f   :  { %v4393_v47 = vpack.c.bf16 %v34_v42, %v33_v41 }
0x1ba1   :  { %3415 = vmatpush3.bf16.msra.mxu1 %v4393_v47 }
0x1ba2   :  { %3432 = vmatprep.subr.bf16.mxu1 %v3975_v33 }
0x1c02   :  { %v2433_v4 = vpop.permute.xlu1 %2432 }
0x1c03   :  { %v2435_v5 = vmul.f32 %v3930_v1, %v2433_v4 }
0x1c05   :  { %2437 = vrot.lane.b32.xlu0 %v2435_v5, %s3974_s21 }
0x1c77   :  { %v2438_v9 = vpop.permute.xlu0 %2437 }
0x1c78   :  { %v4366_v10 = vadd.f32 %v2438_v9, %v2430_v7 }
0x1c7a   :  { %3931 = vtanh.f32 %v4366_v10 }
0x1c7b   :  { %3933 = vpow2.f32 %v3140_v14 }
0x1c84   :  { %v3932_v12 = vpop.eup %3931 }
0x1c85   :  { %2443 = vrot.lane.b32.xlu1 %v3932_v12, %s3974_s21  ;;  %v3934_v18 = vpop.eup %3933 }
0x1c86   :  { %v2424_v19 = vadd.f32 1.0, %v3934_v18 }
0x1c88   :  { %3935 = vrcp.f32 %v2424_v19 }
0x1c92   :  { %v3936_v21 = vpop.eup %3935 }
0x1cf7   :  { %v2444_v22 = vpop.permute.xlu1 %2443 }
0x1cf8   :  { %v2446_v24 = vmul.f32 %v3936_v21, %v2444_v22 }
0x1cfa   :  { %3142 = vmatmul.mubr.msk.f32.vlgmr.msra.gmra.mrb[24].mxu0 %vm322_vm2, %v2446_v24 }
0x1dcd   :  { %v2593_v40 = vpop.f32.mrb[24].mxu0 }
0x1dce   :  { %v2598_v44 = vadd.f32 %v2593_v40, %v253_v37  ;;  %v2595_v45 = vpop.f32.mrb[25].mxu0 }
0x1dcf   :  { %v4395_v48 = vadd.f32 %v2595_v45, %v255_v38 }
0x1dd0   :  { %v3143_v50 = vmul.f32 -1.442695, %v2598_v44 }
0x1dd1   :  { %3937 = vtanh.f32 %v4395_v48 }
0x1dd2   :  { %3939 = vpow2.f32 %v3143_v50 }
0x1ddb   :  { %v3938_v49 = vpop.eup %3937 }
0x1ddc   :  { %2615 = vrot.lane.b32.xlu0 %v3938_v49, %s3974_s21 }
0x1de0   :  { %434 = vrot.lane.b32.xlu0 %v4115_v27, %s3977_s0  ;;  %v3940_v27 = vpop.eup %3939 }
0x1de1   :  { %v2606_v52 = vadd.f32 1.0, %v3940_v27 }
0x1de3   :  { %3941 = vrcp.f32 %v2606_v52 }
0x1de4   :  { %801 = vrot.lane.b32.xlu0 %v4161_v25, %s3977_s0 }
0x1de8   :  { %1167 = vrot.lane.b32.xlu0 %v4207_v30, %s3977_s0 }
0x1dec   :  { %1350 = vrot.lane.b32.xlu0 %v4230_v61, %s3977_s0  ;;  %v4429_v61 = vpop.f32.mrb[28].mxu1 }
0x1ded   :  { %v3942_v25 = vpop.eup %3941 }
0x1df0   :  { %1716 = vrot.lane.b32.xlu0 %v4276_v3, %s3977_s0  ;;  %v4431_v3 = vpop.f32.mrb[29].mxu1 }
0x1df4   :  { %2082 = vrot.lane.b32.xlu0 %v4322_v11, %s3977_s0  ;;  %v2613_v11 = vmul.f32 %v3942_v25, %v4366_v10 }
0x1df8   :  { %2448 = vrot.lane.b32.xlu0 %v2446_v24, %s3977_s0 }
0x1e4e   :  { %v2616_v53 = vpop.permute.xlu0 %2615 }
0x1e4f   :  { %v2618_v54 = vmul.f32 %v3942_v25, %v2616_v53 }
0x1e51   :  { %2620 = vrot.lane.b32.xlu1 %v2618_v54, %s3974_s21 }
0x1e52   :  { %v435_v30 = vpop.permute.xlu0 %434 }
0x1e53   :  { %3238 = vmatmul.mubr.msk.f32.vlgmr.msra.gmra.mrb[30].mxu1 %vm436_vm4, %v435_v30 }
0x1e54   :  { %3434 = vmatpush3.bf16.msra.mxu1 %v4378_v34  ;;  %3248 = vmatprep.mubr.msk.f32.mxu1 %vm3976_vm3, %v3973_v2 }
0x1e55   :  { %618 = vrot.lane.b32.xlu1 %v4138_v57, %s3977_s0  ;;  %3435 = vmatprep.subr.bf16.mxu1 %v3975_v33 }
0x1e58   :  { %3437 = vmatpush3.bf16.msra.mxu1 %v4393_v47 }
0x1e59   :  { %984 = vrot.lane.b32.xlu1 %v4184_v58, %s3977_s0  ;;  %3454 = vmatprep.subr.bf16.mxu1 %v3975_v33  ;;  %v802_v58 = vpop.permute.xlu0 %801 }
0x1ec3   :  { %v2621_v55 = vpop.permute.xlu1 %2620 }
0x1ec4   :  { %v4434_v56 = vadd.f32 %v2621_v55, %v2613_v11 }
0x1ec6   :  { %3943 = vtanh.f32 %v4434_v56 }
0x1ec7   :  { %v619_v57 = vpop.permute.xlu1 %618 }
0x1ec8   :  { %3249 = vmatmul.mubr.msk.f32.vlgmr.msra.gmra.mrb[32].mxu1 %vm436_vm4, %v619_v57 }
0x1ec9   :  { %3456 = vmatpush3.bf16.msra.mxu1 %v4378_v34  ;;  %3259 = vmatprep.mubr.msk.f32.mxu1 %vm3976_vm3, %v3973_v2 }
0x1eca   :  { %3457 = vmatprep.subr.bf16.mxu1 %v3975_v33 }
0x1ecb   :  { %v985_v60 = vpop.permute.xlu1 %984 }
0x1ecd   :  { %3459 = vmatpush3.bf16.msra.mxu1 %v4393_v47 }
0x1ece   :  { %3476 = vmatprep.subr.bf16.mxu1 %v3975_v33 }
0x1ed0   :  { %v3944_v59 = vpop.eup %3943  ;;  %3260 = vmatmul.mubr.msk.f32.vlgmr.msra.gmra.mrb[34].mxu1 %vm436_vm4, %v802_v58 }
0x1ed1   :  { %3478 = vmatpush3.bf16.msra.mxu1 %v4378_v34  ;;  %2626 = vrot.lane.b32.xlu1 %v3944_v59, %s3974_s21 }
0x1ed2   :  { %3479 = vmatprep.subr.bf16.mxu1 %v3975_v33  ;;  %3270 = vmatprep.mubr.msk.f32.mxu1 %vm3976_vm3, %v3973_v2 }
0x1ed5   :  { %3481 = vmatpush3.bf16.msra.mxu1 %v4393_v47  ;;  %1533 = vrot.lane.b32.xlu1 %v4253_v35, %s3977_s0  ;;  %v1168_v35 = vpop.permute.xlu0 %1167 }
0x1ed6   :  { %3498 = vmatprep.subr.bf16.mxu1 %v3975_v33 }
0x1ed8   :  { %3271 = vmatmul.mubr.msk.f32.vlgmr.msra.gmra.mrb[36].mxu1 %vm436_vm4, %v985_v60 }
0x1ed9   :  { %3500 = vmatpush3.bf16.msra.mxu1 %v4378_v34  ;;  %1899 = vrot.lane.b32.xlu1 %v4299_v43, %s3977_s0  ;;  %v1351_v43 = vpop.permute.xlu0 %1350 }
0x1eda   :  { %3501 = vmatprep.subr.bf16.mxu1 %v3975_v33  ;;  %3281 = vmatprep.mubr.msk.f32.mxu1 %vm3976_vm3, %v3973_v2 }
0x1edd   :  { %3503 = vmatpush3.bf16.msra.mxu1 %v4393_v47  ;;  %2265 = vrot.lane.b32.xlu1 %v4345_v51, %s3977_s0  ;;  %v3144_v51 = vmul.f32 -1.442695, %v4395_v48  ;;  %v1717_v12 = vpop.permute.xlu0 %1716 }
0x1ede   :  { %3520 = vmatprep.subr.bf16.mxu1 %v3975_v33 }
0x1edf   :  { %3945 = vpow2.f32 %v3144_v51 }
0x1ee0   :  { %3282 = vmatmul.mubr.msk.f32.vlgmr.msra.gmra.mrb[38].mxu1 %vm436_vm4, %v1168_v35 }
0x1ee1   :  { %3522 = vmatpush3.bf16.msra.mxu1 %v4378_v34  ;;  %3292 = vmatprep.mubr.msk.f32.mxu1 %vm3976_vm3, %v3973_v2  ;;  %v2083_v15 = vpop.permute.xlu0 %2082 }
0x1ee2   :  { %3523 = vmatprep.subr.bf16.mxu1 %v3975_v33 }
0x1ee5   :  { %3525 = vmatpush3.bf16.msra.mxu1 %v4393_v47  ;;  %v2449_v18 = vpop.permute.xlu0 %2448 }
0x1ee6   :  { %3542 = vmatprep.subr.bf16.mxu1 %v3975_v33 }
0x1ee8   :  { %3293 = vmatmul.mubr.msk.f32.vlgmr.msra.gmra.mrb[40].mxu1 %vm436_vm4, %v1351_v43 }
0x1ee9   :  { %3544 = vmatpush3.bf16.msra.mxu1 %v4378_v34  ;;  %3303 = vmatprep.mubr.msk.f32.mxu1 %vm3976_vm3, %v3973_v2  ;;  %v3946_v4 = vpop.eup %3945 }
0x1eea   :  { %3545 = vmatprep.subr.bf16.mxu1 %v3975_v33  ;;  %v2607_v5 = vadd.f32 1.0, %v3946_v4 }
0x1eec   :  { %3947 = vrcp.f32 %v2607_v5  ;;  %v261_v5 = vadd.f32 %v4431_v3, %v4009_v8 }
0x1eed   :  { %3547 = vmatpush3.bf16.msra.mxu1 %v4393_v47 }
0x1eee   :  { %3564 = vmatprep.subr.bf16.mxu1 %v3975_v33 }
0x1ef6   :  { %v3948_v6 = vpop.eup %3947 }
0x1f26   :  { %v505_v63 = vpop.f32.mrb[30].mxu1 }
0x1f27   :  { %v506_v0 = vadd.f32 %v505_v63, %v4483_v62  ;;  %v3239_v1 = vpop.f32.mrb[31].mxu1 }
0x1f29   :  { %509 = vst [vmem:[%s4641_s2] sm:$0xff] %v506_v0 }
0x1f43   :  { %v2627_v7 = vpop.permute.xlu1 %2626 }
0x1f44   :  { %v4489_v9 = vmul.f32 %v3948_v6, %v2627_v7 }
0x1f46   :  { %2631 = vrot.lane.b32.xlu1 %v4489_v9, %s3977_s0 }
0x1f47   :  { %v1534_v10 = vpop.permute.xlu1 %1533 }
0x1f48   :  { %3304 = vmatmul.mubr.msk.f32.vlgmr.msra.gmra.mrb[42].mxu1 %vm436_vm4, %v1534_v10 }
0x1f49   :  { %3566 = vmatpush3.bf16.msra.mxu1 %v4378_v34  ;;  %3314 = vmatprep.mubr.msk.f32.mxu1 %vm3976_vm3, %v3973_v2 }
0x1f4a   :  { %3567 = vmatprep.subr.bf16.mxu1 %v3975_v33 }
0x1f4b   :  { %v1900_v14 = vpop.permute.xlu1 %1899 }
0x1f4d   :  { %3569 = vmatpush3.bf16.msra.mxu1 %v4393_v47 }
0x1f4e   :  { %3586 = vmatprep.subr.bf16.mxu1 %v3975_v33 }
0x1f4f   :  { %v2266_v16 = vpop.permute.xlu1 %2265 }
0x1f50   :  { %3315 = vmatmul.mubr.msk.f32.vlgmr.msra.gmra.mrb[44].mxu1 %vm436_vm4, %v1717_v12  ;;  %v259_v12 = vadd.f32 %v4429_v61, %v4091_v39 }
0x1f51   :  { %3588 = vmatpush3.bf16.msra.mxu1 %v4378_v34  ;;  %3325 = vmatprep.mubr.msk.f32.mxu1 %vm3976_vm3, %v3973_v2 }
0x1f52   :  { %3589 = vmatprep.subr.bf16.mxu1 %v3975_v33 }
0x1f55   :  { %3591 = vmatpush3.bf16.msra.mxu1 %v4393_v47 }
0x1f56   :  { %3608 = vmatprep.subr.bf16.mxu1 %v3975_v33 }
0x1f58   :  { %3326 = vmatmul.mubr.msk.f32.vlgmr.msra.gmra.mrb[46].mxu1 %vm436_vm4, %v1900_v14 }
0x1f59   :  { %3610 = vmatpush3.bf16.msra.mxu1 %v4378_v34  ;;  %3336 = vmatprep.mubr.msk.f32.mxu1 %vm3976_vm3, %v3973_v2 }
0x1f5a   :  { %3611 = vmatprep.subr.bf16.mxu1 %v3975_v33 }
0x1f5d   :  { %3613 = vmatpush3.bf16.msra.mxu1 %v4393_v47 }
0x1f5e   :  { %3630 = vmatprep.subr.bf16.mxu1 %v3975_v33 }
0x1f60   :  { %3337 = vmatmul.mubr.msk.f32.vlgmr.msra.gmra.mrb[48].mxu1 %vm436_vm4, %v2083_v15 }
0x1f61   :  { %3632 = vmatpush3.bf16.msra.mxu1 %v4378_v34  ;;  %3347 = vmatprep.mubr.msk.f32.mxu1 %vm3976_vm3, %v3973_v2 }
0x1f62   :  { %3633 = vmatprep.subr.bf16.mxu1 %v3975_v33 }
0x1f65   :  { %3635 = vmatpush3.bf16.msra.mxu1 %v4393_v47 }
0x1f66   :  { %3652 = vmatprep.subr.bf16.mxu1 %v3975_v33 }
0x1f68   :  { %3348 = vmatmul.mubr.msk.f32.vlgmr.msra.gmra.mrb[50].mxu1 %vm436_vm4, %v2266_v16 }
0x1f69   :  { %3654 = vmatpush3.bf16.msra.mxu1 %v4378_v34  ;;  %3358 = vmatprep.mubr.msk.f32.mxu1 %vm3976_vm3, %v3973_v2 }
0x1f6a   :  { %3655 = vmatprep.subr.bf16.mxu1 %v3975_v33 }
0x1f6d   :  { %3657 = vmatpush3.bf16.msra.mxu1 %v4393_v47 }
0x1f6e   :  { %3674 = vmatprep.subr.bf16.mxu1 %v3975_v33 }
0x1f70   :  { %3359 = vmatmul.mubr.msk.f32.vlgmr.msra.gmra.mrb[52].mxu1 %vm436_vm4, %v2449_v18 }
0x1f71   :  { %3676 = vmatpush3.bf16.msra.mxu1 %v4378_v34  ;;  %3369 = vmatprep.mubr.msk.f32.mxu1 %vm3976_vm3, %v3973_v2 }
0x1f72   :  { %3677 = vmatprep.subr.bf16.mxu1 %v3975_v33 }
0x1f75   :  { %3679 = vmatpush3.bf16.msra.mxu1 %v4393_v47 }
0x1f76   :  { %3681 = vmatprep.subr.bf16.mxu1 %v4017_v13 }
0x1f9b   :  { %v688_v19 = vpop.f32.mrb[32].mxu1 }
0x1f9c   :  { %v689_v21 = vadd.f32 %v688_v19, %v4483_v62  ;;  %v3250_v22 = vpop.f32.mrb[33].mxu1 }
0x1f9e   :  { %692 = vst [vmem:[%s4641_s2 + $0x8] sm:$0xff] %v689_v21 }
0x1fa3   :  { %v871_v24 = vpop.f32.mrb[34].mxu1 }
0x1fa4   :  { %v872_v28 = vadd.f32 %v871_v24, %v4483_v62  ;;  %v3261_v31 = vpop.f32.mrb[35].mxu1 }
0x1fa6   :  { %875 = vst [vmem:[%s4641_s2 + $0x10] sm:$0xff] %v872_v28 }
0x1fab   :  { %v1054_v37 = vpop.f32.mrb[36].mxu1 }
0x1fac   :  { %v1055_v38 = vadd.f32 %v1054_v37, %v4483_v62  ;;  %v3272_v40 = vpop.f32.mrb[37].mxu1 }
0x1fae   :  { %1058 = vst [vmem:[%s4641_s2 + $0x18] sm:$0xff] %v1055_v38 }
0x1fb3   :  { %v1237_v41 = vpop.f32.mrb[38].mxu1 }
0x1fb4   :  { %v1238_v42 = vadd.f32 %v1237_v41, %v4483_v62  ;;  %v3283_v44 = vpop.f32.mrb[39].mxu1 }
0x1fb6   :  { %1241 = vst [vmem:[%s4641_s2 + $0x20] sm:$0xff] %v1238_v42 }
0x1fb8   :  { %v2632_v45 = vpop.permute.xlu1 %2631 }
0x1fb9   :  { %3370 = vmatmul.mubr.msk.f32.vlgmr.msra.gmra.mrb[54].mxu1 %vm436_vm4, %v2632_v45 }
0x1fba   :  { %3683 = vmatpush1.bf16.msra.mxu1 %v4026_v17  ;;  %2774 = vmatprep.mubr.f32.mxu1 %v3973_v2 }
0x1fbb   :  { %v1420_v46 = vpop.f32.mrb[40].mxu1  ;;  %3685 = vmatprep.subr.bf16.mxu1 %v4036_v20 }
0x1fbc   :  { %v1421_v48 = vadd.f32 %v1420_v46, %v4483_v62  ;;  %v3294_v49 = vpop.f32.mrb[41].mxu1 }
0x1fbe   :  { %1424 = vst [vmem:[%s4641_s2 + $0x28] sm:$0xff] %v1421_v48  ;;  %3687 = vmatpush1.bf16.msra.mxu1 %v4044_v23 }
0x1fbf   :  { %3689 = vmatprep.subr.bf16.mxu1 %v4054_v26 }
0x1fc2   :  { %3691 = vmatpush1.bf16.msra.mxu1 %v4062_v29 }
0x1fc3   :  { %3693 = vmatprep.subr.bf16.mxu1 %v4072_v32 }
0x1fc6   :  { %3695 = vmatpush1.bf16.msra.mxu1 %v4080_v36 }
0x1fc7   :  { %3696 = vmatprep.subr.bf16.mxu1 %v3975_v33 }
0x1fc9   :  { %3146 = vmatmul.mubr.msk.f32.vlgmr.msra.gmra.mrb[56].mxu1 %vm322_vm2, %v4489_v9 }
0x1fca   :  { %3698 = vmatpush3.bf16.msra.mxu1 %v4378_v34  ;;  %3380 = vmatprep.mubr.msk.f32.mxu1 %vm3976_vm3, %v3973_v2 }
0x1fcb   :  { %3699 = vmatprep.subr.bf16.mxu1 %v3975_v33 }
0x1fce   :  { %3701 = vmatpush3.bf16.msra.mxu1 %v4393_v47 }
0x1fcf   :  { %3703 = vmatprep.subr.bf16.mxu1 %v4017_v13 }
0x201b   :  { %v1603_v50 = vpop.f32.mrb[42].mxu1 }
0x201c   :  { %v1604_v27 = vadd.f32 %v1603_v50, %v4483_v62  ;;  %v3305_v52 = vpop.f32.mrb[43].mxu1 }
0x201e   :  { %1607 = vst [vmem:[%s4641_s2 + $0x30] sm:$0xff] %v1604_v27 }
0x2023   :  { %v1786_v25 = vpop.f32.mrb[44].mxu1 }
0x2024   :  { %v1787_v53 = vadd.f32 %v1786_v25, %v4483_v62  ;;  %v3316_v54 = vpop.f32.mrb[45].mxu1 }
0x2026   :  { %1790 = vst [vmem:[%s4641_s2 + $0x38] sm:$0xff] %v1787_v53 }
0x202b   :  { %v1969_v30 = vpop.f32.mrb[46].mxu1 }
0x202c   :  { %v1970_v11 = vadd.f32 %v1969_v30, %v4483_v62  ;;  %v3327_v13 = vpop.f32.mrb[47].mxu1 }
0x202e   :  { %1973 = vst [vmem:[%s4641_s2 + $0x40] sm:$0xff] %v1970_v11 }
0x2033   :  { %v2152_v55 = vpop.f32.mrb[48].mxu1 }
0x2034   :  { %v2153_v57 = vadd.f32 %v2152_v55, %v4483_v62  ;;  %v3338_v58 = vpop.f32.mrb[49].mxu1 }
0x2036   :  { %2156 = vst [vmem:[%s4641_s2 + $0x48] sm:$0xff] %v2153_v57 }
0x203b   :  { %v2335_v59 = vpop.f32.mrb[50].mxu1 }
0x203c   :  { %v2336_v60 = vadd.f32 %v2335_v59, %v4483_v62  ;;  %v3349_v35 = vpop.f32.mrb[51].mxu1 }
0x203e   :  { %2339 = vst [vmem:[%s4641_s2 + $0x50] sm:$0xff] %v2336_v60 }
0x2043   :  { %v2518_v43 = vpop.f32.mrb[52].mxu1 }
0x2044   :  { %v2519_v51 = vadd.f32 %v2518_v43, %v4483_v62  ;;  %v3360_v63 = vpop.f32.mrb[53].mxu1 }
0x2046   :  { %2522 = vst [vmem:[%s4641_s2 + $0x58] sm:$0xff] %v2519_v51 }
0x208c   :  { %v2701_v0 = vpop.f32.mrb[54].mxu1 }
0x208d   :  { %v2702_v1 = vadd.f32 %v2701_v0, %v4483_v62  ;;  %v3371_v4 = vpop.f32.mrb[55].mxu1 }
0x208f   :  { %2705 = vst [vmem:[%s4641_s2 + $0x60] sm:$0xff] %v2702_v1 }
0x209c   :  { %v2776_v6 = vpop.f32.mrb[56].mxu1 }
0x209d   :  { %v2778_v7 = vpop.f32.mrb[57].mxu1  ;;  %v2781_v14 = vadd.f32 %v2776_v6, %v259_v12 }
0x209e   :  { %v2782_v9 = vadd.f32 %v2778_v7, %v261_v5 }
0x209f   :  { %v3147_v15 = vmul.f32 -1.442695, %v2781_v14 }
0x20a0   :  { %3949 = vtanh.f32 %v2782_v9  ;;  %v3148_v39 = vmul.f32 -1.442695, %v2782_v9 }
0x20a1   :  { %3951 = vpow2.f32 %v3147_v15 }
0x20aa   :  { %v3950_v10 = vpop.eup %3949 }
0x20ab   :  { %2798 = vrot.lane.b32.xlu0 %v3950_v10, %s3974_s21  ;;  %v3952_v16 = vpop.eup %3951 }
0x20ac   :  { %v2789_v18 = vadd.f32 1.0, %v3952_v16 }
0x20ae   :  { %3953 = vrcp.f32 %v2789_v18 }
0x20b8   :  { %v3954_v19 = vpop.eup %3953 }
0x20b9   :  { %v2796_v8 = vmul.f32 %v3954_v19, %v4434_v56 }
0x211d   :  { %v2799_v21 = vpop.permute.xlu0 %2798 }
0x211e   :  { %v2801_v22 = vmul.f32 %v3954_v19, %v2799_v21 }
0x2120   :  { %2803 = vrot.lane.b32.xlu1 %v2801_v22, %s3974_s21 }
0x2192   :  { %v2804_v3 = vpop.permute.xlu1 %2803 }
0x2193   :  { %v2806_v24 = vadd.f32 %v2804_v3, %v2796_v8 }
0x2195   :  { %3955 = vtanh.f32 %v2806_v24 }
0x2196   :  { %3957 = vpow2.f32 %v3148_v39 }
0x219f   :  { %v3956_v28 = vpop.eup %3955 }
0x21a0   :  { %2809 = vrot.lane.b32.xlu0 %v3956_v28, %s3974_s21  ;;  %v3958_v61 = vpop.eup %3957 }
0x21a1   :  { %v2790_v31 = vadd.f32 1.0, %v3958_v61 }
0x21a3   :  { %3959 = vrcp.f32 %v2790_v31 }
0x21ad   :  { %v3960_v37 = vpop.eup %3959 }
0x2212   :  { %v2810_v38 = vpop.permute.xlu0 %2809 }
0x2213   :  { %v2812_v40 = vmul.f32 %v3960_v37, %v2810_v38 }
0x2215   :  { %2814 = vrot.lane.b32.xlu1 %v2812_v40, %s3977_s0 }
0x2287   :  { %v2815_v41 = vpop.permute.xlu1 %2814 }
0x2288   :  { %3381 = vmatmul.mubr.msk.f32.vlgmr.msra.gmra.mrb[58].mxu1 %vm436_vm4, %v2815_v41 }
0x2289   :  { %3705 = vmatpush1.bf16.msra.mxu1 %v4026_v17  ;;  %2957 = vmatprep.mubr.f32.mxu1 %v3973_v2 }
0x228a   :  { %3707 = vmatprep.subr.bf16.mxu1 %v4036_v20 }
0x228d   :  { %3709 = vmatpush1.bf16.msra.mxu1 %v4044_v23 }
0x228e   :  { %3711 = vmatprep.subr.bf16.mxu1 %v4054_v26 }
0x2291   :  { %3713 = vmatpush1.bf16.msra.mxu1 %v4062_v29 }
0x2292   :  { %3715 = vmatprep.subr.bf16.mxu1 %v4072_v32 }
0x2295   :  { %3717 = vmatpush1.bf16.msra.mxu1 %v4080_v36 }
0x2296   :  { %3718 = vmatprep.subr.bf16.mxu1 %v3975_v33 }
0x2298   :  { %3150 = vmatmul.mubr.msk.f32.vlgmr.msra.gmra.mrb[60].mxu1 %vm322_vm2, %v2812_v40 }
0x2299   :  { %3720 = vmatpush3.bf16.msra.mxu1 %v4378_v34  ;;  %3391 = vmatprep.mubr.msk.f32.mxu1 %vm3976_vm3, %v3973_v2 }
0x229a   :  { %3721 = vmatprep.subr.bf16.mxu1 %v3975_v33 }
0x229d   :  { %3723 = vmatpush3.bf16.msra.mxu1 %v4393_v47 }
0x235b   :  { %v2884_v17 = vpop.f32.mrb[58].mxu1 }
0x235c   :  { %v2885_v20 = vadd.f32 %v2884_v17, %v4483_v62  ;;  %v3382_v23 = vpop.f32.mrb[59].mxu1 }
0x235e   :  { %2888 = vst [vmem:[%s4641_s2 + $0x68] sm:$0xff] %v2885_v20 }
0x236b   :  { %v2959_v26 = vpop.f32.mrb[60].mxu1 }
0x236c   :  { %v2961_v29 = vpop.f32.mrb[61].mxu1  ;;  %v2964_v2 = vadd.f32 %v2959_v26, %v259_v12 }
0x236d   :  { %v2965_v32 = vadd.f32 %v2961_v29, %v261_v5 }
0x236e   :  { %v3151_v34 = vmul.f32 -1.442695, %v2964_v2 }
0x236f   :  { %3961 = vtanh.f32 %v2965_v32  ;;  %v3152_v50 = vmul.f32 -1.442695, %v2965_v32 }
0x2370   :  { %3963 = vpow2.f32 %v3151_v34 }
0x2379   :  { %v3962_v36 = vpop.eup %3961 }
0x237a   :  { %2981 = vrot.lane.b32.xlu0 %v3962_v36, %s3974_s21  ;;  %v3964_v33 = vpop.eup %3963 }
0x237b   :  { %v2972_v47 = vadd.f32 1.0, %v3964_v33 }
0x237d   :  { %3965 = vrcp.f32 %v2972_v47 }
0x2387   :  { %v3966_v56 = vpop.eup %3965 }
0x2388   :  { %v2979_v45 = vmul.f32 %v3966_v56, %v2806_v24 }
0x23ec   :  { %v2982_v42 = vpop.permute.xlu0 %2981 }
0x23ed   :  { %v2984_v44 = vmul.f32 %v3966_v56, %v2982_v42 }
0x23ef   :  { %2986 = vrot.lane.b32.xlu1 %v2984_v44, %s3974_s21 }
0x2461   :  { %v2987_v46 = vpop.permute.xlu1 %2986 }
0x2462   :  { %v2989_v48 = vadd.f32 %v2987_v46, %v2979_v45 }
0x2464   :  { %3967 = vtanh.f32 %v2989_v48 }
0x2465   :  { %3969 = vpow2.f32 %v3152_v50 }
0x246e   :  { %v3968_v49 = vpop.eup %3967 }
0x246f   :  { %2992 = vrot.lane.b32.xlu0 %v3968_v49, %s3974_s21  ;;  %v3970_v27 = vpop.eup %3969 }
0x2470   :  { %v2973_v52 = vadd.f32 1.0, %v3970_v27 }
0x2472   :  { %3971 = vrcp.f32 %v2973_v52 }
0x247c   :  { %v3972_v25 = vpop.eup %3971 }
0x24e1   :  { %v2993_v53 = vpop.permute.xlu0 %2992 }
0x24e2   :  { %v2995_v54 = vmul.f32 %v3972_v25, %v2993_v53 }
0x24e4   :  { %2997 = vrot.lane.b32.xlu1 %v2995_v54, %s3977_s0 }
0x2556   :  { %v2998_v30 = vpop.permute.xlu1 %2997 }
0x2557   :  { %3392 = vmatmul.mubr.msk.f32.vlgmr.msra.gmra.mrb[62].mxu1 %vm436_vm4, %v2998_v30 }
0x262a   :  { %v3067_v11 = vpop.f32.mrb[62].mxu1 }
0x262b   :  { %v3068_v13 = vadd.f32 %v3067_v11, %v4483_v62  ;;  %v3393_v55 = vpop.f32.mrb[63].mxu1 }
0x262d   :  { %3071 = vst [vmem:[%s4641_s2 + $0x70] sm:$0xff] %v3068_v13 }

</bundles_post_ra>
